<compile_context>
chip_gen: v7x
topology: tpu7x:2x2x1
jax: 0.10.0
libtpu: 0.0.40
codegen_flags: <defaults>
</compile_context>

<pallas_src>
import jax
import jax.numpy as jnp
from jax import lax
from jax.experimental import pallas as pl
from jax.experimental.pallas import tpu as pltpu

HIDDEN = 64          # LSTM hidden size (PyTorch module spec)
HP = 128             # per-gate lane-padded width (vreg lane count)


def lstm_fc_kernel(xproj_ref, w_hh_ref, w_fc_ref, b_fc_ref, out_ref):
    """Full LSTM recurrence (input projection precomputed) + final Linear.

    xproj_ref : (T, B, 4*HP)  time-major  x @ W_ih + b  (gate-padded, f32)
    w_hh_ref  : (HP, 4*HP)    hidden->gates weights (gate-padded, transposed)
    w_fc_ref  : (HP, F)       fc weights (row-padded, transposed)
    b_fc_ref  : (1, F)        fc bias
    out_ref   : (B, F)        fc(h_T)
    """
    T, B, _ = xproj_ref.shape

    # Hoist loop-invariant weight load out of the recurrence.
    w_hh = w_hh_ref[...]                                   # (HP, 4*HP)

    h0 = jnp.zeros((B, HP), jnp.float32)
    c0 = jnp.zeros((B, HP), jnp.float32)

    def step(t, carry):
        h, c = carry
        gates = xproj_ref[t] + jnp.dot(
            h, w_hh, preferred_element_type=jnp.float32)   # (B, 4*HP)
        # Gate order i, f, g, o (PyTorch); slices are 128-lane aligned.
        i_g = jax.nn.sigmoid(gates[:, 0 * HP:1 * HP])
        f_g = jax.nn.sigmoid(gates[:, 1 * HP:2 * HP])
        g_g = jnp.tanh(gates[:, 2 * HP:3 * HP])
        o_g = jax.nn.sigmoid(gates[:, 3 * HP:4 * HP])
        c_new = f_g * c + i_g * g_g
        h_new = o_g * jnp.tanh(c_new)
        return h_new, c_new

    # T is static and small: fully unroll for cross-iteration scheduling.
    h_fin, _ = lax.fori_loop(0, T, step, (h0, c0), unroll=True)

    out_ref[...] = (
        jnp.dot(h_fin, w_fc_ref[...], preferred_element_type=jnp.float32)
        + b_fc_ref[...]
    ).astype(out_ref.dtype)


def _pad_gate_cols(m):
    """(K, 4*H) -> (K, 4*HP): pad each 64-col gate block to 128 cols (zeros)."""
    K = m.shape[0]
    blocks = m.reshape(K, 4, HIDDEN)
    padded = jnp.pad(blocks, ((0, 0), (0, 0), (0, HP - HIDDEN)))
    return padded.reshape(K, 4 * HP)


def neural_network_forward(x, params):
    """x: (B, T, F) float32.  Returns (1, B, F) matching PyTorch fc(hidden)."""
    w_ih, w_hh, b_ih, b_hh, w_fc, b_fc = (
        params["w_ih"], params["w_hh"], params["b_ih"], params["b_hh"],
        params["w_fc"], params["b_fc"],
    )
    B, T, F = x.shape
    H = HIDDEN

    # Gate-padded weights / bias (zero columns -> padded lanes stay inert).
    w_ih_p = _pad_gate_cols(w_ih.T)                                  # (F, 4*HP)
    w_hh_p = jnp.pad(_pad_gate_cols(w_hh.T), ((0, HP - H), (0, 0)))  # (HP, 4*HP)
    b_p = _pad_gate_cols((b_ih + b_hh).reshape(1, 4 * H))            # (1, 4*HP)
    w_fc_p = jnp.pad(w_fc.T, ((0, HP - H), (0, 0)))                  # (HP, F)
    b_fc_2d = b_fc.reshape(1, F)                                     # (1, F)

    # Hoisted input projection for ALL timesteps in one matmul, fused with the
    # batch-first -> time-major transpose and the bias add.
    x_proj = jnp.einsum(
        "btf,fg->tbg", x, w_ih_p, preferred_element_type=jnp.float32
    ) + b_p                                                          # (T, B, 4*HP)

    vmem = pl.BlockSpec(memory_space=pltpu.MemorySpace.VMEM)
    out = pl.pallas_call(
        lstm_fc_kernel,
        out_shape=jax.ShapeDtypeStruct((B, F), jnp.float32),
        in_specs=[vmem] * 4,
        out_specs=vmem,
    )(x_proj, w_hh_p, w_fc_p, b_fc_2d)

    return out.reshape(1, B, F)  # PyTorch: fc(hidden) with hidden (1, B, 64)


def init_params(num_feature, key):
    """Deterministic init mimicking PyTorch uniform(-1/sqrt(fan), 1/sqrt(fan))."""
    H = HIDDEN
    ks = jax.random.split(key, 6)
    bound = 1.0 / jnp.sqrt(H)
    u = lambda k, shape: jax.random.uniform(
        k, shape, jnp.float32, minval=-bound, maxval=bound)
    return {
        "w_ih": u(ks[0], (4 * H, num_feature)),
        "w_hh": u(ks[1], (4 * H, H)),
        "b_ih": u(ks[2], (4 * H,)),
        "b_hh": u(ks[3], (4 * H,)),
        "w_fc": u(ks[4], (num_feature, H)),
        "b_fc": u(ks[5], (num_feature,)),
    }


def reference_forward(x, params):
    """Pure-JAX reference of the same PyTorch semantics (for verification)."""
    H = HIDDEN
    B, T, F = x.shape
    w_ih, w_hh = params["w_ih"], params["w_hh"]
    b = params["b_ih"] + params["b_hh"]
    h = jnp.zeros((B, H), jnp.float32)
    c = jnp.zeros((B, H), jnp.float32)
    for t in range(T):
        gates = x[:, t, :] @ w_ih.T + h @ w_hh.T + b
        i_g = jax.nn.sigmoid(gates[:, 0 * H:1 * H])
        f_g = jax.nn.sigmoid(gates[:, 1 * H:2 * H])
        g_g = jnp.tanh(gates[:, 2 * H:3 * H])
        o_g = jax.nn.sigmoid(gates[:, 3 * H:4 * H])
        c = f_g * c + i_g * g_g
        h = o_g * jnp.tanh(c)
    out = h @ params["w_fc"].T + params["b_fc"]
    return out.reshape(1, B, F)


if __name__ == "__main__":
    B, T, F = 2, 8, 32  # batch=2, seq=8, num_feature=32
    x = jax.random.normal(jax.random.PRNGKey(0), (B, T, F), jnp.float32)
    params = init_params(F, jax.random.PRNGKey(42))

    y = neural_network_forward(x, params)
    y = jax.block_until_ready(y)

    y_ref = reference_forward(x, params)
    assert y.shape == (1, B, F), y.shape
    assert jnp.allclose(y, y_ref, atol=1e-4, rtol=1e-4), "mismatch vs reference"

    print("KERNEL_OK")
</pallas_src>

<mosaic_0001>
module attributes {stable_mosaic.version = 11 : i64} {
  func.func @lstm_fc_kernel(%arg0: memref<8x2x512xf32, #tpu.memory_space<vmem>>, %arg1: memref<128x512xf32, #tpu.memory_space<vmem>>, %arg2: memref<128x32xf32, #tpu.memory_space<vmem>>, %arg3: memref<1x32xf32, #tpu.memory_space<vmem>>, %arg4: memref<2x32xf32, #tpu.memory_space<vmem>>) attributes {dimension_semantics = [], scalar_prefetch = 0 : i64, scratch_operands = 0 : i64, tpu.core_type = #tpu.core_type<tc>} {
    %c0 = arith.constant 0 : index
    %c0_0 = arith.constant 0 : index
    %0 = vector.load %arg1[%c0, %c0_0] : memref<128x512xf32, #tpu.memory_space<vmem>>, vector<128x512xf32>
    %cst = arith.constant 0.000000e+00 : f32
    %1 = vector.broadcast %cst : f32 to vector<2x128xf32>
    %cst_1 = arith.constant 0.000000e+00 : f32
    %2 = vector.broadcast %cst_1 : f32 to vector<2x128xf32>
    %c0_i32 = arith.constant 0 : i32
    %3 = arith.index_cast %c0_i32 : i32 to index
    %c0_2 = arith.constant 0 : index
    %c0_3 = arith.constant 0 : index
    %4 = vector.load %arg0[%3, %c0_2, %c0_3] : memref<8x2x512xf32, #tpu.memory_space<vmem>>, vector<1x2x512xf32>
    %5 = vector.shape_cast %4 : vector<1x2x512xf32> to vector<2x512xf32>
    %cst_4 = arith.constant dense<0.000000e+00> : vector<2x512xf32>
    %6 = tpu.matmul %1, %0, %cst_4 {dimension_numbers = #tpu.dot_dimension_numbers<[1], [0], [0], [1], [0, 0, 1, 1], [], []>} : vector<2x128xf32>, vector<128x512xf32>, vector<2x512xf32> -> vector<2x512xf32>
    %7 = arith.addf %5, %6 : vector<2x512xf32>
    %8 = vector.extract_strided_slice %7 {offsets = [0, 0], sizes = [2, 128], strides = [1, 1]} : vector<2x512xf32> to vector<2x128xf32>
    %9 = arith.negf %8 : vector<2x128xf32>
    %10 = math.exp %9 : vector<2x128xf32>
    %cst_5 = arith.constant 1.000000e+00 : f32
    %11 = vector.broadcast %cst_5 : f32 to vector<2x128xf32>
    %12 = arith.addf %11, %10 : vector<2x128xf32>
    %13 = arith.divf %11, %12 : vector<2x128xf32>
    %14 = vector.extract_strided_slice %7 {offsets = [0, 128], sizes = [2, 128], strides = [1, 1]} : vector<2x512xf32> to vector<2x128xf32>
    %15 = arith.negf %14 : vector<2x128xf32>
    %16 = math.exp %15 : vector<2x128xf32>
    %cst_6 = arith.constant 1.000000e+00 : f32
    %17 = vector.broadcast %cst_6 : f32 to vector<2x128xf32>
    %18 = arith.addf %17, %16 : vector<2x128xf32>
    %19 = arith.divf %17, %18 : vector<2x128xf32>
    %20 = vector.extract_strided_slice %7 {offsets = [0, 256], sizes = [2, 128], strides = [1, 1]} : vector<2x512xf32> to vector<2x128xf32>
    %21 = math.tanh %20 : vector<2x128xf32>
    %22 = vector.extract_strided_slice %7 {offsets = [0, 384], sizes = [2, 128], strides = [1, 1]} : vector<2x512xf32> to vector<2x128xf32>
    %23 = arith.negf %22 : vector<2x128xf32>
    %24 = math.exp %23 : vector<2x128xf32>
    %cst_7 = arith.constant 1.000000e+00 : f32
    %25 = vector.broadcast %cst_7 : f32 to vector<2x128xf32>
    %26 = arith.addf %25, %24 : vector<2x128xf32>
    %27 = arith.divf %25, %26 : vector<2x128xf32>
    %28 = arith.mulf %19, %2 : vector<2x128xf32>
    %29 = arith.mulf %13, %21 : vector<2x128xf32>
    %30 = arith.addf %28, %29 : vector<2x128xf32>
    %31 = math.tanh %30 : vector<2x128xf32>
    %32 = arith.mulf %27, %31 : vector<2x128xf32>
    %c1_i32 = arith.constant 1 : i32
    %33 = arith.index_cast %c1_i32 : i32 to index
    %c0_8 = arith.constant 0 : index
    %c0_9 = arith.constant 0 : index
    %34 = vector.load %arg0[%33, %c0_8, %c0_9] : memref<8x2x512xf32, #tpu.memory_space<vmem>>, vector<1x2x512xf32>
    %35 = vector.shape_cast %34 : vector<1x2x512xf32> to vector<2x512xf32>
    %cst_10 = arith.constant dense<0.000000e+00> : vector<2x512xf32>
    %36 = tpu.matmul %32, %0, %cst_10 {dimension_numbers = #tpu.dot_dimension_numbers<[1], [0], [0], [1], [0, 0, 1, 1], [], []>} : vector<2x128xf32>, vector<128x512xf32>, vector<2x512xf32> -> vector<2x512xf32>
    %37 = arith.addf %35, %36 : vector<2x512xf32>
    %38 = vector.extract_strided_slice %37 {offsets = [0, 0], sizes = [2, 128], strides = [1, 1]} : vector<2x512xf32> to vector<2x128xf32>
    %39 = arith.negf %38 : vector<2x128xf32>
    %40 = math.exp %39 : vector<2x128xf32>
    %cst_11 = arith.constant 1.000000e+00 : f32
    %41 = vector.broadcast %cst_11 : f32 to vector<2x128xf32>
    %42 = arith.addf %41, %40 : vector<2x128xf32>
    %43 = arith.divf %41, %42 : vector<2x128xf32>
    %44 = vector.extract_strided_slice %37 {offsets = [0, 128], sizes = [2, 128], strides = [1, 1]} : vector<2x512xf32> to vector<2x128xf32>
    %45 = arith.negf %44 : vector<2x128xf32>
    %46 = math.exp %45 : vector<2x128xf32>
    %cst_12 = arith.constant 1.000000e+00 : f32
    %47 = vector.broadcast %cst_12 : f32 to vector<2x128xf32>
    %48 = arith.addf %47, %46 : vector<2x128xf32>
    %49 = arith.divf %47, %48 : vector<2x128xf32>
    %50 = vector.extract_strided_slice %37 {offsets = [0, 256], sizes = [2, 128], strides = [1, 1]} : vector<2x512xf32> to vector<2x128xf32>
    %51 = math.tanh %50 : vector<2x128xf32>
    %52 = vector.extract_strided_slice %37 {offsets = [0, 384], sizes = [2, 128], strides = [1, 1]} : vector<2x512xf32> to vector<2x128xf32>
    %53 = arith.negf %52 : vector<2x128xf32>
    %54 = math.exp %53 : vector<2x128xf32>
    %cst_13 = arith.constant 1.000000e+00 : f32
    %55 = vector.broadcast %cst_13 : f32 to vector<2x128xf32>
    %56 = arith.addf %55, %54 : vector<2x128xf32>
    %57 = arith.divf %55, %56 : vector<2x128xf32>
    %58 = arith.mulf %49, %30 : vector<2x128xf32>
    %59 = arith.mulf %43, %51 : vector<2x128xf32>
    %60 = arith.addf %58, %59 : vector<2x128xf32>
    %61 = math.tanh %60 : vector<2x128xf32>
    %62 = arith.mulf %57, %61 : vector<2x128xf32>
    %c2_i32 = arith.constant 2 : i32
    %63 = arith.index_cast %c2_i32 : i32 to index
    %c0_14 = arith.constant 0 : index
    %c0_15 = arith.constant 0 : index
    %64 = vector.load %arg0[%63, %c0_14, %c0_15] : memref<8x2x512xf32, #tpu.memory_space<vmem>>, vector<1x2x512xf32>
    %65 = vector.shape_cast %64 : vector<1x2x512xf32> to vector<2x512xf32>
    %cst_16 = arith.constant dense<0.000000e+00> : vector<2x512xf32>
    %66 = tpu.matmul %62, %0, %cst_16 {dimension_numbers = #tpu.dot_dimension_numbers<[1], [0], [0], [1], [0, 0, 1, 1], [], []>} : vector<2x128xf32>, vector<128x512xf32>, vector<2x512xf32> -> vector<2x512xf32>
    %67 = arith.addf %65, %66 : vector<2x512xf32>
    %68 = vector.extract_strided_slice %67 {offsets = [0, 0], sizes = [2, 128], strides = [1, 1]} : vector<2x512xf32> to vector<2x128xf32>
    %69 = arith.negf %68 : vector<2x128xf32>
    %70 = math.exp %69 : vector<2x128xf32>
    %cst_17 = arith.constant 1.000000e+00 : f32
    %71 = vector.broadcast %cst_17 : f32 to vector<2x128xf32>
    %72 = arith.addf %71, %70 : vector<2x128xf32>
    %73 = arith.divf %71, %72 : vector<2x128xf32>
    %74 = vector.extract_strided_slice %67 {offsets = [0, 128], sizes = [2, 128], strides = [1, 1]} : vector<2x512xf32> to vector<2x128xf32>
    %75 = arith.negf %74 : vector<2x128xf32>
    %76 = math.exp %75 : vector<2x128xf32>
    %cst_18 = arith.constant 1.000000e+00 : f32
    %77 = vector.broadcast %cst_18 : f32 to vector<2x128xf32>
    %78 = arith.addf %77, %76 : vector<2x128xf32>
    %79 = arith.divf %77, %78 : vector<2x128xf32>
    %80 = vector.extract_strided_slice %67 {offsets = [0, 256], sizes = [2, 128], strides = [1, 1]} : vector<2x512xf32> to vector<2x128xf32>
    %81 = math.tanh %80 : vector<2x128xf32>
    %82 = vector.extract_strided_slice %67 {offsets = [0, 384], sizes = [2, 128], strides = [1, 1]} : vector<2x512xf32> to vector<2x128xf32>
    %83 = arith.negf %82 : vector<2x128xf32>
    %84 = math.exp %83 : vector<2x128xf32>
    %cst_19 = arith.constant 1.000000e+00 : f32
    %85 = vector.broadcast %cst_19 : f32 to vector<2x128xf32>
    %86 = arith.addf %85, %84 : vector<2x128xf32>
    %87 = arith.divf %85, %86 : vector<2x128xf32>
    %88 = arith.mulf %79, %60 : vector<2x128xf32>
    %89 = arith.mulf %73, %81 : vector<2x128xf32>
    %90 = arith.addf %88, %89 : vector<2x128xf32>
    %91 = math.tanh %90 : vector<2x128xf32>
    %92 = arith.mulf %87, %91 : vector<2x128xf32>
    %c3_i32 = arith.constant 3 : i32
    %93 = arith.index_cast %c3_i32 : i32 to index
    %c0_20 = arith.constant 0 : index
    %c0_21 = arith.constant 0 : index
    %94 = vector.load %arg0[%93, %c0_20, %c0_21] : memref<8x2x512xf32, #tpu.memory_space<vmem>>, vector<1x2x512xf32>
    %95 = vector.shape_cast %94 : vector<1x2x512xf32> to vector<2x512xf32>
    %cst_22 = arith.constant dense<0.000000e+00> : vector<2x512xf32>
    %96 = tpu.matmul %92, %0, %cst_22 {dimension_numbers = #tpu.dot_dimension_numbers<[1], [0], [0], [1], [0, 0, 1, 1], [], []>} : vector<2x128xf32>, vector<128x512xf32>, vector<2x512xf32> -> vector<2x512xf32>
    %97 = arith.addf %95, %96 : vector<2x512xf32>
    %98 = vector.extract_strided_slice %97 {offsets = [0, 0], sizes = [2, 128], strides = [1, 1]} : vector<2x512xf32> to vector<2x128xf32>
    %99 = arith.negf %98 : vector<2x128xf32>
    %100 = math.exp %99 : vector<2x128xf32>
    %cst_23 = arith.constant 1.000000e+00 : f32
    %101 = vector.broadcast %cst_23 : f32 to vector<2x128xf32>
    %102 = arith.addf %101, %100 : vector<2x128xf32>
    %103 = arith.divf %101, %102 : vector<2x128xf32>
    %104 = vector.extract_strided_slice %97 {offsets = [0, 128], sizes = [2, 128], strides = [1, 1]} : vector<2x512xf32> to vector<2x128xf32>
    %105 = arith.negf %104 : vector<2x128xf32>
    %106 = math.exp %105 : vector<2x128xf32>
    %cst_24 = arith.constant 1.000000e+00 : f32
    %107 = vector.broadcast %cst_24 : f32 to vector<2x128xf32>
    %108 = arith.addf %107, %106 : vector<2x128xf32>
    %109 = arith.divf %107, %108 : vector<2x128xf32>
    %110 = vector.extract_strided_slice %97 {offsets = [0, 256], sizes = [2, 128], strides = [1, 1]} : vector<2x512xf32> to vector<2x128xf32>
    %111 = math.tanh %110 : vector<2x128xf32>
    %112 = vector.extract_strided_slice %97 {offsets = [0, 384], sizes = [2, 128], strides = [1, 1]} : vector<2x512xf32> to vector<2x128xf32>
    %113 = arith.negf %112 : vector<2x128xf32>
    %114 = math.exp %113 : vector<2x128xf32>
    %cst_25 = arith.constant 1.000000e+00 : f32
    %115 = vector.broadcast %cst_25 : f32 to vector<2x128xf32>
    %116 = arith.addf %115, %114 : vector<2x128xf32>
    %117 = arith.divf %115, %116 : vector<2x128xf32>
    %118 = arith.mulf %109, %90 : vector<2x128xf32>
    %119 = arith.mulf %103, %111 : vector<2x128xf32>
    %120 = arith.addf %118, %119 : vector<2x128xf32>
    %121 = math.tanh %120 : vector<2x128xf32>
    %122 = arith.mulf %117, %121 : vector<2x128xf32>
    %c4_i32 = arith.constant 4 : i32
    %123 = arith.index_cast %c4_i32 : i32 to index
    %c0_26 = arith.constant 0 : index
    %c0_27 = arith.constant 0 : index
    %124 = vector.load %arg0[%123, %c0_26, %c0_27] : memref<8x2x512xf32, #tpu.memory_space<vmem>>, vector<1x2x512xf32>
    %125 = vector.shape_cast %124 : vector<1x2x512xf32> to vector<2x512xf32>
    %cst_28 = arith.constant dense<0.000000e+00> : vector<2x512xf32>
    %126 = tpu.matmul %122, %0, %cst_28 {dimension_numbers = #tpu.dot_dimension_numbers<[1], [0], [0], [1], [0, 0, 1, 1], [], []>} : vector<2x128xf32>, vector<128x512xf32>, vector<2x512xf32> -> vector<2x512xf32>
    %127 = arith.addf %125, %126 : vector<2x512xf32>
    %128 = vector.extract_strided_slice %127 {offsets = [0, 0], sizes = [2, 128], strides = [1, 1]} : vector<2x512xf32> to vector<2x128xf32>
    %129 = arith.negf %128 : vector<2x128xf32>
    %130 = math.exp %129 : vector<2x128xf32>
    %cst_29 = arith.constant 1.000000e+00 : f32
    %131 = vector.broadcast %cst_29 : f32 to vector<2x128xf32>
    %132 = arith.addf %131, %130 : vector<2x128xf32>
    %133 = arith.divf %131, %132 : vector<2x128xf32>
    %134 = vector.extract_strided_slice %127 {offsets = [0, 128], sizes = [2, 128], strides = [1, 1]} : vector<2x512xf32> to vector<2x128xf32>
    %135 = arith.negf %134 : vector<2x128xf32>
    %136 = math.exp %135 : vector<2x128xf32>
    %cst_30 = arith.constant 1.000000e+00 : f32
    %137 = vector.broadcast %cst_30 : f32 to vector<2x128xf32>
    %138 = arith.addf %137, %136 : vector<2x128xf32>
    %139 = arith.divf %137, %138 : vector<2x128xf32>
    %140 = vector.extract_strided_slice %127 {offsets = [0, 256], sizes = [2, 128], strides = [1, 1]} : vector<2x512xf32> to vector<2x128xf32>
    %141 = math.tanh %140 : vector<2x128xf32>
    %142 = vector.extract_strided_slice %127 {offsets = [0, 384], sizes = [2, 128], strides = [1, 1]} : vector<2x512xf32> to vector<2x128xf32>
    %143 = arith.negf %142 : vector<2x128xf32>
    %144 = math.exp %143 : vector<2x128xf32>
    %cst_31 = arith.constant 1.000000e+00 : f32
    %145 = vector.broadcast %cst_31 : f32 to vector<2x128xf32>
    %146 = arith.addf %145, %144 : vector<2x128xf32>
    %147 = arith.divf %145, %146 : vector<2x128xf32>
    %148 = arith.mulf %139, %120 : vector<2x128xf32>
    %149 = arith.mulf %133, %141 : vector<2x128xf32>
    %150 = arith.addf %148, %149 : vector<2x128xf32>
    %151 = math.tanh %150 : vector<2x128xf32>
    %152 = arith.mulf %147, %151 : vector<2x128xf32>
    %c5_i32 = arith.constant 5 : i32
    %153 = arith.index_cast %c5_i32 : i32 to index
    %c0_32 = arith.constant 0 : index
    %c0_33 = arith.constant 0 : index
    %154 = vector.load %arg0[%153, %c0_32, %c0_33] : memref<8x2x512xf32, #tpu.memory_space<vmem>>, vector<1x2x512xf32>
    %155 = vector.shape_cast %154 : vector<1x2x512xf32> to vector<2x512xf32>
    %cst_34 = arith.constant dense<0.000000e+00> : vector<2x512xf32>
    %156 = tpu.matmul %152, %0, %cst_34 {dimension_numbers = #tpu.dot_dimension_numbers<[1], [0], [0], [1], [0, 0, 1, 1], [], []>} : vector<2x128xf32>, vector<128x512xf32>, vector<2x512xf32> -> vector<2x512xf32>
    %157 = arith.addf %155, %156 : vector<2x512xf32>
    %158 = vector.extract_strided_slice %157 {offsets = [0, 0], sizes = [2, 128], strides = [1, 1]} : vector<2x512xf32> to vector<2x128xf32>
    %159 = arith.negf %158 : vector<2x128xf32>
    %160 = math.exp %159 : vector<2x128xf32>
    %cst_35 = arith.constant 1.000000e+00 : f32
    %161 = vector.broadcast %cst_35 : f32 to vector<2x128xf32>
    %162 = arith.addf %161, %160 : vector<2x128xf32>
    %163 = arith.divf %161, %162 : vector<2x128xf32>
    %164 = vector.extract_strided_slice %157 {offsets = [0, 128], sizes = [2, 128], strides = [1, 1]} : vector<2x512xf32> to vector<2x128xf32>
    %165 = arith.negf %164 : vector<2x128xf32>
    %166 = math.exp %165 : vector<2x128xf32>
    %cst_36 = arith.constant 1.000000e+00 : f32
    %167 = vector.broadcast %cst_36 : f32 to vector<2x128xf32>
    %168 = arith.addf %167, %166 : vector<2x128xf32>
    %169 = arith.divf %167, %168 : vector<2x128xf32>
    %170 = vector.extract_strided_slice %157 {offsets = [0, 256], sizes = [2, 128], strides = [1, 1]} : vector<2x512xf32> to vector<2x128xf32>
    %171 = math.tanh %170 : vector<2x128xf32>
    %172 = vector.extract_strided_slice %157 {offsets = [0, 384], sizes = [2, 128], strides = [1, 1]} : vector<2x512xf32> to vector<2x128xf32>
    %173 = arith.negf %172 : vector<2x128xf32>
    %174 = math.exp %173 : vector<2x128xf32>
    %cst_37 = arith.constant 1.000000e+00 : f32
    %175 = vector.broadcast %cst_37 : f32 to vector<2x128xf32>
    %176 = arith.addf %175, %174 : vector<2x128xf32>
    %177 = arith.divf %175, %176 : vector<2x128xf32>
    %178 = arith.mulf %169, %150 : vector<2x128xf32>
    %179 = arith.mulf %163, %171 : vector<2x128xf32>
    %180 = arith.addf %178, %179 : vector<2x128xf32>
    %181 = math.tanh %180 : vector<2x128xf32>
    %182 = arith.mulf %177, %181 : vector<2x128xf32>
    %c6_i32 = arith.constant 6 : i32
    %183 = arith.index_cast %c6_i32 : i32 to index
    %c0_38 = arith.constant 0 : index
    %c0_39 = arith.constant 0 : index
    %184 = vector.load %arg0[%183, %c0_38, %c0_39] : memref<8x2x512xf32, #tpu.memory_space<vmem>>, vector<1x2x512xf32>
    %185 = vector.shape_cast %184 : vector<1x2x512xf32> to vector<2x512xf32>
    %cst_40 = arith.constant dense<0.000000e+00> : vector<2x512xf32>
    %186 = tpu.matmul %182, %0, %cst_40 {dimension_numbers = #tpu.dot_dimension_numbers<[1], [0], [0], [1], [0, 0, 1, 1], [], []>} : vector<2x128xf32>, vector<128x512xf32>, vector<2x512xf32> -> vector<2x512xf32>
    %187 = arith.addf %185, %186 : vector<2x512xf32>
    %188 = vector.extract_strided_slice %187 {offsets = [0, 0], sizes = [2, 128], strides = [1, 1]} : vector<2x512xf32> to vector<2x128xf32>
    %189 = arith.negf %188 : vector<2x128xf32>
    %190 = math.exp %189 : vector<2x128xf32>
    %cst_41 = arith.constant 1.000000e+00 : f32
    %191 = vector.broadcast %cst_41 : f32 to vector<2x128xf32>
    %192 = arith.addf %191, %190 : vector<2x128xf32>
    %193 = arith.divf %191, %192 : vector<2x128xf32>
    %194 = vector.extract_strided_slice %187 {offsets = [0, 128], sizes = [2, 128], strides = [1, 1]} : vector<2x512xf32> to vector<2x128xf32>
    %195 = arith.negf %194 : vector<2x128xf32>
    %196 = math.exp %195 : vector<2x128xf32>
    %cst_42 = arith.constant 1.000000e+00 : f32
    %197 = vector.broadcast %cst_42 : f32 to vector<2x128xf32>
    %198 = arith.addf %197, %196 : vector<2x128xf32>
    %199 = arith.divf %197, %198 : vector<2x128xf32>
    %200 = vector.extract_strided_slice %187 {offsets = [0, 256], sizes = [2, 128], strides = [1, 1]} : vector<2x512xf32> to vector<2x128xf32>
    %201 = math.tanh %200 : vector<2x128xf32>
    %202 = vector.extract_strided_slice %187 {offsets = [0, 384], sizes = [2, 128], strides = [1, 1]} : vector<2x512xf32> to vector<2x128xf32>
    %203 = arith.negf %202 : vector<2x128xf32>
    %204 = math.exp %203 : vector<2x128xf32>
    %cst_43 = arith.constant 1.000000e+00 : f32
    %205 = vector.broadcast %cst_43 : f32 to vector<2x128xf32>
    %206 = arith.addf %205, %204 : vector<2x128xf32>
    %207 = arith.divf %205, %206 : vector<2x128xf32>
    %208 = arith.mulf %199, %180 : vector<2x128xf32>
    %209 = arith.mulf %193, %201 : vector<2x128xf32>
    %210 = arith.addf %208, %209 : vector<2x128xf32>
    %211 = math.tanh %210 : vector<2x128xf32>
    %212 = arith.mulf %207, %211 : vector<2x128xf32>
    %c7_i32 = arith.constant 7 : i32
    %213 = arith.index_cast %c7_i32 : i32 to index
    %c0_44 = arith.constant 0 : index
    %c0_45 = arith.constant 0 : index
    %214 = vector.load %arg0[%213, %c0_44, %c0_45] : memref<8x2x512xf32, #tpu.memory_space<vmem>>, vector<1x2x512xf32>
    %215 = vector.shape_cast %214 : vector<1x2x512xf32> to vector<2x512xf32>
    %cst_46 = arith.constant dense<0.000000e+00> : vector<2x512xf32>
    %216 = tpu.matmul %212, %0, %cst_46 {dimension_numbers = #tpu.dot_dimension_numbers<[1], [0], [0], [1], [0, 0, 1, 1], [], []>} : vector<2x128xf32>, vector<128x512xf32>, vector<2x512xf32> -> vector<2x512xf32>
    %217 = arith.addf %215, %216 : vector<2x512xf32>
    %218 = vector.extract_strided_slice %217 {offsets = [0, 0], sizes = [2, 128], strides = [1, 1]} : vector<2x512xf32> to vector<2x128xf32>
    %219 = arith.negf %218 : vector<2x128xf32>
    %220 = math.exp %219 : vector<2x128xf32>
    %cst_47 = arith.constant 1.000000e+00 : f32
    %221 = vector.broadcast %cst_47 : f32 to vector<2x128xf32>
    %222 = arith.addf %221, %220 : vector<2x128xf32>
    %223 = arith.divf %221, %222 : vector<2x128xf32>
    %224 = vector.extract_strided_slice %217 {offsets = [0, 128], sizes = [2, 128], strides = [1, 1]} : vector<2x512xf32> to vector<2x128xf32>
    %225 = arith.negf %224 : vector<2x128xf32>
    %226 = math.exp %225 : vector<2x128xf32>
    %cst_48 = arith.constant 1.000000e+00 : f32
    %227 = vector.broadcast %cst_48 : f32 to vector<2x128xf32>
    %228 = arith.addf %227, %226 : vector<2x128xf32>
    %229 = arith.divf %227, %228 : vector<2x128xf32>
    %230 = vector.extract_strided_slice %217 {offsets = [0, 256], sizes = [2, 128], strides = [1, 1]} : vector<2x512xf32> to vector<2x128xf32>
    %231 = math.tanh %230 : vector<2x128xf32>
    %232 = vector.extract_strided_slice %217 {offsets = [0, 384], sizes = [2, 128], strides = [1, 1]} : vector<2x512xf32> to vector<2x128xf32>
    %233 = arith.negf %232 : vector<2x128xf32>
    %234 = math.exp %233 : vector<2x128xf32>
    %cst_49 = arith.constant 1.000000e+00 : f32
    %235 = vector.broadcast %cst_49 : f32 to vector<2x128xf32>
    %236 = arith.addf %235, %234 : vector<2x128xf32>
    %237 = arith.divf %235, %236 : vector<2x128xf32>
    %238 = arith.mulf %229, %210 : vector<2x128xf32>
    %239 = arith.mulf %223, %231 : vector<2x128xf32>
    %240 = arith.addf %238, %239 : vector<2x128xf32>
    %241 = math.tanh %240 : vector<2x128xf32>
    %242 = arith.mulf %237, %241 : vector<2x128xf32>
    %c8_i32 = arith.constant 8 : i32
    %c0_50 = arith.constant 0 : index
    %c0_51 = arith.constant 0 : index
    %243 = vector.load %arg2[%c0_50, %c0_51] : memref<128x32xf32, #tpu.memory_space<vmem>>, vector<128x32xf32>
    %cst_52 = arith.constant dense<0.000000e+00> : vector<2x32xf32>
    %244 = tpu.matmul %242, %243, %cst_52 {dimension_numbers = #tpu.dot_dimension_numbers<[1], [0], [0], [1], [0, 0, 1, 1], [], []>} : vector<2x128xf32>, vector<128x32xf32>, vector<2x32xf32> -> vector<2x32xf32>
    %c0_53 = arith.constant 0 : index
    %c0_54 = arith.constant 0 : index
    %245 = vector.load %arg3[%c0_53, %c0_54] : memref<1x32xf32, #tpu.memory_space<vmem>>, vector<1x32xf32>
    %246 = vector.broadcast %245 : vector<1x32xf32> to vector<2x32xf32>
    %247 = arith.addf %244, %246 : vector<2x32xf32>
    %c0_55 = arith.constant 0 : index
    %c0_56 = arith.constant 0 : index
    %248 = vector.load %arg4[%c0_55, %c0_56] : memref<2x32xf32, #tpu.memory_space<vmem>>, vector<2x32xf32>
    tpu.vector_store %arg4[%c0_55, %c0_56], %247 {strides = array<i32>} : memref<2x32xf32, #tpu.memory_space<vmem>>, vector<2x32xf32>,
    return
  }
}

</mosaic_0001>

<bundles_post_ra>
// kernel: tpu_custom_call.1
= control target key start
LH: loop header
LB: loop body
LE: loop exit
PB: predicated region body
PF: predicated region fallthrough
CT: control target
= control target key end

     0   :  { %9 = vsyncpa [#allocation3], 0  ;;  %s3110_s0 = inlined_call_operand.vmem [shape: f32[8,2,512], index: 0, kind: input, shape index: {}]   ;;  %s3111_s1 = inlined_call_operand.hbm [shape: f32[128,512], index: 1, kind: input, shape index: {}]   ;;  %s3112_s2 = inlined_call_operand.vmem [shape: f32[128,32], index: 2, kind: input, shape index: {}]   ;;  %s3113_s3 = inlined_call_operand.vmem [shape: f32[1,32], index: 3, kind: input, shape index: {}]   ;;  %s3114_s4 = inlined_call_operand.hbm [shape: f32[2,32], index: 4, kind: output, shape index: {}]  }
   0x1   :  { %10 = vsyncpa [#allocation4], 0  ;;  %s2593_s15 = smov [#allocation2]   ;;  %s2545_s19 = scalar_lea.hbm %s3111_s1, 8192 }
   0x2   :  { %s18_s16 = sshll.u32 %s2593_s15, 4  ;;  %p2546_p0 = scmp.ne.s32.totalorder %s3111_s1, %s2545_s19  ;;  %s19_s16 = int_to_ptr.vmem [resolvable:$true] %s18_s16 }
   0x3   :  { %p2549_p1 = scmp.lt.u32.totalorder %s2545_s19, %s3111_s1 }
   0x5   :  { %p2551_p2 = pnand %p2549_p1, %p2546_p0 }
   0x7   :  { %2554 = shalt.err (!%p2551_p2)
}
   0x8   :  { %s2555_s24 = scalar_lea.vmem %s19_s16, 8192  ;;  %p2560_p4 = scmp.lt.s32.totalorder %s19_s16, %s19_s16 }
   0x9   :  { %p2556_p3 = scmp.ne.s32.totalorder %s19_s16, %s2555_s24  ;;  %p2561_p5 = scmp.lt.s32.totalorder %s2555_s24, %s2555_s24 }
   0xb   :  { %p2562_p6 = por %p2561_p5, %p2560_p4 }
   0xd   :  { %p2563_p7 = pnand %p2562_p6, %p2556_p3 }
   0xf   :  { %2566 = shalt.err (!%p2563_p7)
}
  0x10   :  { %s2594_s25 = smov 512   ;;  %s2595_s26 = smov 32  }
  0x11   :  { %24 = dma.hbm_to_vmem [thread:$0]  %s3111_s1, 8192, %s19_s16, [#allocation3], %s2594_s25, %s2594_s25, %s2595_s26  }
  0x12   :  { %2589 = dma.done.wait [#allocation3], 8192  }
  0x13   :  { %2590 = vsyncadd [#allocation3], 4294959104  ;;  %v2596_v0 = vmov 0.0   ;;  %v33_v1 = vld [vmem:[#allocation2 + $0x8] sm:$0xff]  ;;  %v35_v3 = vld [vmem:[#allocation2 + $0x18] sm:$0xff]  ;;  %vm2599_vm0 = vmmov 0  }
  0x14   :  { %161 = vmatprep.mubr.f32.mxu0 %v2596_v0  ;;  %232 = vmatprep.mubr.f32.mxu1 %v2596_v0  ;;  %v37_v2 = vld [vmem:[#allocation2 + $0x28] sm:$0xff]  ;;  %v39_v5 = vld [vmem:[#allocation2 + $0x38] sm:$0xff]  ;;  %v32_v6 = vld [vmem:[#allocation2] sm:$0xff]  ;;  %s2600_s23 = smov [#allocation5]   ;;  %vm1772_vm1 = vcmask 254976  }
  0x15   :  { %v2640_v4 = vpack.c.bf16 %v37_v2, %v33_v1  ;;  %v36_v7 = vld [vmem:[#allocation2 + $0x20] sm:$0xff]  ;;  %v2642_v8 = vpack.c.bf16 %v39_v5, %v35_v3  ;;  %v34_v10 = vld [vmem:[#allocation2 + $0x10] sm:$0xff]  ;;  %v41_v12 = vld [vmem:[#allocation2 + $0x48] sm:$0xff]  ;;  %s1780_s24 = sshll.u32 %s2600_s23, 4  ;;  %s1781_s24 = int_to_ptr.vmem [resolvable:$true] %s1780_s24 }
  0x16   :  { %v2644_v9 = vpack.c.bf16 %v36_v7, %v32_v6  ;;  %v38_v11 = vld [vmem:[#allocation2 + $0x30] sm:$0xff]  ;;  %v45_v14 = vld [vmem:[#allocation2 + $0x68] sm:$0xff]  ;;  %v43_v15 = vld [vmem:[#allocation2 + $0x58] sm:$0xff]  ;;  %s2567_s25 = scalar_lea.vmem %s1781_s24, 32  ;;  %p2572_p9 = scmp.lt.s32.totalorder %s1781_s24, %s1781_s24 }
  0x17   :  { %1874 = vmatprep.subr.bf16.mxu0 %v2640_v4  ;;  %v2647_v13 = vpack.c.bf16 %v38_v11, %v34_v10  ;;  %v47_v16 = vld [vmem:[#allocation2 + $0x78] sm:$0xff]  ;;  %1906 = vmatprep.subr.bf16.mxu1 %v2642_v8  ;;  %v2651_v17 = vpack.c.bf16 %v45_v14, %v41_v12  ;;  %v40_v19 = vld [vmem:[#allocation2 + $0x40] sm:$0xff]  ;;  %v42_v21 = vld [vmem:[#allocation2 + $0x50] sm:$0xff]  ;;  %p2568_p8 = scmp.ne.s32.totalorder %s1781_s24, %s2567_s25  ;;  %p2573_p10 = scmp.lt.s32.totalorder %s2567_s25, %s2567_s25 }
  0x18   :  { %1876 = vmatpush1.bf16.msra.mxu0 %v2644_v9  ;;  %v2653_v18 = vpack.c.bf16 %v47_v16, %v43_v15  ;;  %v44_v20 = vld [vmem:[#allocation2 + $0x60] sm:$0xff]  ;;  %v46_v23 = vld [vmem:[#allocation2 + $0x70] sm:$0xff]  ;;  %v49_v24 = vld [vmem:[#allocation2 + $0x88] sm:$0xff] }
  0x19   :  { %1908 = vmatpush1.bf16.msra.mxu1 %v2647_v13  ;;  %v2656_v22 = vpack.c.bf16 %v44_v20, %v40_v19  ;;  %v53_v25 = vld [vmem:[#allocation2 + $0xa8] sm:$0xff]  ;;  %1878 = vmatprep.subr.bf16.mxu0 %v2651_v17  ;;  %v2660_v26 = vpack.c.bf16 %v46_v23, %v42_v21  ;;  %v51_v28 = vld [vmem:[#allocation2 + $0x98] sm:$0xff]  ;;  %v48_v30 = vld [vmem:[#allocation2 + $0x80] sm:$0xff]  ;;  %p2574_p11 = por %p2573_p10, %p2572_p9 }
  0x1a   :  { %1910 = vmatprep.subr.bf16.mxu1 %v2653_v18  ;;  %v2662_v27 = vpack.c.bf16 %v53_v25, %v49_v24  ;;  %v55_v29 = vld [vmem:[#allocation2 + $0xb8] sm:$0xff]  ;;  %v52_v32 = vld [vmem:[#allocation2 + $0xa0] sm:$0xff]  ;;  %v50_v33 = vld [vmem:[#allocation2 + $0x90] sm:$0xff] }
  0x1b   :  { %v2664_v31 = vpack.c.bf16 %v55_v29, %v51_v28  ;;  %v54_v34 = vld [vmem:[#allocation2 + $0xb0] sm:$0xff]  ;;  %v2667_v35 = vpack.c.bf16 %v52_v32, %v48_v30  ;;  %v57_v36 = vld [vmem:[#allocation2 + $0xc8] sm:$0xff]  ;;  %v59_v38 = vld [vmem:[#allocation2 + $0xd8] sm:$0xff]  ;;  %p2575_p12 = pnand %p2574_p11, %p2568_p8 }
  0x1c   :  { %1880 = vmatpush1.bf16.msra.mxu0 %v2656_v22  ;;  %v61_v37 = vld [vmem:[#allocation2 + $0xe8] sm:$0xff]  ;;  %v2671_v39 = vpack.c.bf16 %v54_v34, %v50_v33  ;;  %v63_v41 = vld [vmem:[#allocation2 + $0xf8] sm:$0xff]  ;;  %v56_v42 = vld [vmem:[#allocation2 + $0xc0] sm:$0xff] }
  0x1d   :  { %1912 = vmatpush1.bf16.msra.mxu1 %v2660_v26  ;;  %1882 = vmatprep.subr.bf16.mxu0 %v2662_v27  ;;  %v2673_v40 = vpack.c.bf16 %v61_v37, %v57_v36  ;;  %v60_v43 = vld [vmem:[#allocation2 + $0xe0] sm:$0xff]  ;;  %v2676_v44 = vpack.c.bf16 %v63_v41, %v59_v38  ;;  %v58_v45 = vld [vmem:[#allocation2 + $0xd0] sm:$0xff]  ;;  %v65_v47 = vld [vmem:[#allocation2 + $0x108] sm:$0xff] }
  0x1e   :  { %1914 = vmatprep.subr.bf16.mxu1 %v2664_v31  ;;  %v62_v46 = vld [vmem:[#allocation2 + $0xf0] sm:$0xff]  ;;  %v69_v48 = vld [vmem:[#allocation2 + $0x128] sm:$0xff]  ;;  %v67_v49 = vld [vmem:[#allocation2 + $0x118] sm:$0xff]  ;;  %v2679_v51 = vpack.c.bf16 %v60_v43, %v56_v42 }
  0x1f   :  { %v71_v50 = vld [vmem:[#allocation2 + $0x138] sm:$0xff]  ;;  %v2683_v52 = vpack.c.bf16 %v62_v46, %v58_v45  ;;  %v2685_v53 = vpack.c.bf16 %v69_v48, %v65_v47  ;;  %v64_v54 = vld [vmem:[#allocation2 + $0x100] sm:$0xff]  ;;  %v66_v56 = vld [vmem:[#allocation2 + $0x110] sm:$0xff]  ;;  %v2597_v48 = vmov 1983009808  }
  0x20   :  { %1884 = vmatpush1.bf16.msra.mxu0 %v2667_v35  ;;  %v68_v55 = vld [vmem:[#allocation2 + $0x120] sm:$0xff]  ;;  %v2688_v57 = vpack.c.bf16 %v71_v50, %v67_v49  ;;  %v70_v58 = vld [vmem:[#allocation2 + $0x130] sm:$0xff]  ;;  %v73_v59 = vld [vmem:[#allocation2 + $0x148] sm:$0xff]  ;;  %v246_v49 = vunpack.c.l.s4 %v2597_v48  ;;  %v248_v50 = vlaneseq }
  0x21   :  { %1916 = vmatpush1.bf16.msra.mxu1 %v2671_v39  ;;  %1886 = vmatprep.subr.bf16.mxu0 %v2673_v40  ;;  %v77_v60 = vld [vmem:[#allocation2 + $0x168] sm:$0xff]  ;;  %v75_v61 = vld [vmem:[#allocation2 + $0x158] sm:$0xff]  ;;  %v2691_v63 = vpack.c.bf16 %v68_v55, %v64_v54  ;;  %v2695_v1 = vpack.c.bf16 %v70_v58, %v66_v56  ;;  %v72_v3 = vld [vmem:[#allocation2 + $0x140] sm:$0xff] }
  0x22   :  { %1918 = vmatprep.subr.bf16.mxu1 %v2676_v44  ;;  %v79_v62 = vld [vmem:[#allocation2 + $0x178] sm:$0xff]  ;;  %v2697_v2 = vpack.c.bf16 %v77_v60, %v73_v59  ;;  %v76_v5 = vld [vmem:[#allocation2 + $0x160] sm:$0xff]  ;;  %v74_v6 = vld [vmem:[#allocation2 + $0x150] sm:$0xff]  ;;  %v247_v54 = vunpack.c.0.s8 %v246_v49  ;;  %v249_v55 = vshrl.u32 %v248_v50, 7 }
  0x23   :  { %v2700_v7 = vpack.c.bf16 %v79_v62, %v75_v61  ;;  %v78_v10 = vld [vmem:[#allocation2 + $0x170] sm:$0xff]  ;;  %v81_v11 = vld [vmem:[#allocation2 + $0x188] sm:$0xff]  ;;  %v83_v14 = vld [vmem:[#allocation2 + $0x198] sm:$0xff]  ;;  %v2703_v16 = vpack.c.bf16 %v76_v5, %v72_v3 }
  0x24   :  { %1888 = vmatpush1.bf16.msra.mxu0 %v2679_v51  ;;  %v85_v12 = vld [vmem:[#allocation2 + $0x1a8] sm:$0xff]  ;;  %v87_v15 = vld [vmem:[#allocation2 + $0x1b8] sm:$0xff]  ;;  %v2707_v19 = vpack.c.bf16 %v78_v10, %v74_v6  ;;  %v80_v21 = vld [vmem:[#allocation2 + $0x180] sm:$0xff]  ;;  %v2774_v58 = vsub.s32 %v247_v54, %v249_v55 }
  0x25   :  { %1920 = vmatpush1.bf16.msra.mxu1 %v2683_v52  ;;  %1890 = vmatprep.subr.bf16.mxu0 %v2685_v53  ;;  %v2709_v20 = vpack.c.bf16 %v85_v12, %v81_v11  ;;  %v84_v23 = vld [vmem:[#allocation2 + $0x1a0] sm:$0xff]  ;;  %v82_v24 = vld [vmem:[#allocation2 + $0x190] sm:$0xff]  ;;  %v2712_v25 = vpack.c.bf16 %v87_v15, %v83_v14  ;;  %v89_v29 = vld [vmem:[#allocation2 + $0x1c8] sm:$0xff] }
  0x26   :  { %1922 = vmatprep.subr.bf16.mxu1 %v2688_v57  ;;  %v86_v28 = vld [vmem:[#allocation2 + $0x1b0] sm:$0xff]  ;;  %v93_v30 = vld [vmem:[#allocation2 + $0x1e8] sm:$0xff]  ;;  %v91_v32 = vld [vmem:[#allocation2 + $0x1d8] sm:$0xff]  ;;  %v2715_v34 = vpack.c.bf16 %v84_v23, %v80_v21 }
  0x27   :  { %v95_v33 = vld [vmem:[#allocation2 + $0x1f8] sm:$0xff]  ;;  %v2719_v36 = vpack.c.bf16 %v86_v28, %v82_v24  ;;  %v2721_v37 = vpack.c.bf16 %v93_v30, %v89_v29  ;;  %v88_v38 = vld [vmem:[#allocation2 + $0x1c0] sm:$0xff]  ;;  %v90_v43 = vld [vmem:[#allocation2 + $0x1d0] sm:$0xff] }
  0x28   :  { %1892 = vmatpush1.bf16.msra.mxu0 %v2691_v63  ;;  %v92_v41 = vld [vmem:[#allocation2 + $0x1e0] sm:$0xff]  ;;  %v2724_v42 = vpack.c.bf16 %v95_v33, %v91_v32  ;;  %v94_v45 = vld [vmem:[#allocation2 + $0x1f0] sm:$0xff] }
  0x29   :  { %1924 = vmatpush1.bf16.msra.mxu1 %v2695_v1  ;;  %1894 = vmatprep.subr.bf16.mxu0 %v2697_v2  ;;  %v2727_v46 = vpack.c.bf16 %v92_v41, %v88_v38  ;;  %v2731_v47 = vpack.c.bf16 %v94_v45, %v90_v43  ;;  %v96_v10 = vld [vmem:[%s3110_s0] sm:$0xff] }
  0x2a   :  { %1926 = vmatprep.subr.bf16.mxu1 %v2700_v7 }
  0x2c   :  { %1896 = vmatpush1.bf16.msra.mxu0 %v2703_v16 }
  0x2d   :  { %1928 = vmatpush1.bf16.msra.mxu1 %v2707_v19  ;;  %1898 = vmatprep.subr.bf16.mxu0 %v2709_v20 }
  0x2e   :  { %1930 = vmatprep.subr.bf16.mxu1 %v2712_v25 }
  0x30   :  { %1900 = vmatpush1.bf16.msra.mxu0 %v2715_v34 }
  0x31   :  { %1932 = vmatpush1.bf16.msra.mxu1 %v2719_v36  ;;  %1902 = vmatprep.subr.bf16.mxu0 %v2721_v37 }
  0x32   :  { %1934 = vmatprep.subr.bf16.mxu1 %v2724_v42 }
  0x34   :  { %1904 = vmatpush1.bf16.msra.mxu0 %v2727_v46 }
  0x35   :  { %1936 = vmatpush1.bf16.msra.mxu1 %v2731_v47  ;;  %1938 = vmatprep.subr.bf16.mxu0 %v2640_v4 }
  0x36   :  { %1970 = vmatprep.subr.bf16.mxu1 %v2642_v8 }
  0x37   :  { %162 = vmatmul.mubr.f32.vlgmr.msra.gmra.mrb[0].mxu0 %v2596_v0 }
  0x38   :  { %233 = vmatmul.mubr.f32.vlgmr.msra.gmra.mrb[0].mxu1 %v2596_v0  ;;  %1940 = vmatpush1.bf16.msra.mxu0 %v2644_v9 }
  0x39   :  { %1972 = vmatpush1.bf16.msra.mxu1 %v2647_v13  ;;  %1942 = vmatprep.subr.bf16.mxu0 %v2651_v17 }
  0x3a   :  { %1974 = vmatprep.subr.bf16.mxu1 %v2653_v18  ;;  %359 = vmatprep.mubr.f32.mxu0 %v2596_v0 }
  0x3b   :  { %430 = vmatprep.mubr.f32.mxu1 %v2596_v0 }
  0x3c   :  { %1944 = vmatpush1.bf16.msra.mxu0 %v2656_v22 }
  0x3d   :  { %1976 = vmatpush1.bf16.msra.mxu1 %v2660_v26  ;;  %1946 = vmatprep.subr.bf16.mxu0 %v2662_v27 }
  0x3e   :  { %1978 = vmatprep.subr.bf16.mxu1 %v2664_v31 }
  0x40   :  { %1948 = vmatpush1.bf16.msra.mxu0 %v2667_v35 }
  0x41   :  { %1980 = vmatpush1.bf16.msra.mxu1 %v2671_v39  ;;  %1950 = vmatprep.subr.bf16.mxu0 %v2673_v40 }
  0x42   :  { %1982 = vmatprep.subr.bf16.mxu1 %v2676_v44 }
  0x44   :  { %1952 = vmatpush1.bf16.msra.mxu0 %v2679_v51 }
  0x45   :  { %1984 = vmatpush1.bf16.msra.mxu1 %v2683_v52  ;;  %1954 = vmatprep.subr.bf16.mxu0 %v2685_v53 }
  0x46   :  { %1986 = vmatprep.subr.bf16.mxu1 %v2688_v57 }
  0x48   :  { %1956 = vmatpush1.bf16.msra.mxu0 %v2691_v63 }
  0x49   :  { %1988 = vmatpush1.bf16.msra.mxu1 %v2695_v1  ;;  %1958 = vmatprep.subr.bf16.mxu0 %v2697_v2 }
  0x4a   :  { %1990 = vmatprep.subr.bf16.mxu1 %v2700_v7 }
  0x4c   :  { %1960 = vmatpush1.bf16.msra.mxu0 %v2703_v16 }
  0x4d   :  { %1992 = vmatpush1.bf16.msra.mxu1 %v2707_v19  ;;  %1962 = vmatprep.subr.bf16.mxu0 %v2709_v20 }
  0x4e   :  { %1994 = vmatprep.subr.bf16.mxu1 %v2712_v25 }
  0x50   :  { %1964 = vmatpush1.bf16.msra.mxu0 %v2715_v34 }
  0x51   :  { %1996 = vmatpush1.bf16.msra.mxu1 %v2719_v36  ;;  %1966 = vmatprep.subr.bf16.mxu0 %v2721_v37 }
  0x52   :  { %1998 = vmatprep.subr.bf16.mxu1 %v2724_v42 }
  0x54   :  { %1968 = vmatpush1.bf16.msra.mxu0 %v2727_v46 }
  0x55   :  { %2000 = vmatpush1.bf16.msra.mxu1 %v2731_v47  ;;  %2002 = vmatprep.subr.bf16.mxu0 %v2640_v4 }
  0x56   :  { %2034 = vmatprep.subr.bf16.mxu1 %v2642_v8 }
 0x10a   :  { %v163_v56 = vpop.f32.mrb[0].mxu0 }
 0x10b   :  { %v234_v59 = vpop.f32.mrb[0].mxu1  ;;  %v165_v60 = vpop.f32.mrb[1].mxu0 }
 0x10c   :  { %v243_v61 = vcombine.low %v163_v56, %v165_v60  ;;  %v236_v62 = vpop.f32.mrb[1].mxu1 }
 0x10d   :  { %v244_v3 = vcombine.low %v234_v59, %v236_v62 }
 0x10e   :  { %v251_v5 = vrot.slane %v243_v61, %v2774_v58 }
 0x10f   :  { %v258_v6 = vrot.slane %v244_v3, %v2774_v58 }
 0x111   :  { %v259_v11 = vcombine.low %v251_v5, %v258_v6 }
 0x113   :  { %v261_v12 = vadd.f32 %v259_v11, %v96_v10 }
 0x115   :  { %v1789_v14 = vmul.f32 -1.442695, %v261_v12  ;;  %v269_v15 = vrot.slane %v261_v12, 2  ;;  %v280_v23 = vrot.slane %v261_v12, 6  ;;  %v277_v29 = vrot.slane %v261_v12, 4  ;;  %v1792_v12 = vld [vmem:[%s3110_s0 + $0x8] sm:$0xff] }
 0x117   :  { %2417 = vpow2.f32 %v1789_v14  ;;  %v1790_v21 = vmul.f32 -1.442695, %v269_v15  ;;  %v1791_v24 = vmul.f32 -1.442695, %v280_v23 }
 0x119   :  { %2419 = vpow2.f32 %v1790_v21 }
 0x11a   :  { %2421 = vpow2.f32 %v1791_v24 }
 0x121   :  { %v2418_v28 = vpop.eup %2417 }
 0x122   :  { %v265_v30 = vadd.f32 1.0, %v2418_v28 }
 0x123   :  { %v2420_v32 = vpop.eup %2419 }
 0x124   :  { %2423 = vrcp.f32 %v265_v30  ;;  %v274_v33 = vadd.f32 1.0, %v2420_v32  ;;  %v2422_v38 = vpop.eup %2421 }
 0x125   :  { %2425 = vtanh.f32 %v277_v29  ;;  %v285_v48 = vadd.f32 1.0, %v2422_v38 }
 0x126   :  { %2427 = vrcp.f32 %v274_v33 }
 0x127   :  { %2429 = vrcp.f32 %v285_v48 }
 0x12e   :  { %v2424_v41 = vpop.eup %2423 }
 0x12f   :  { %v2426_v43 = vpop.eup %2425 }
 0x130   :  { %v2428_v45 = vpop.eup %2427  ;;  %v289_v50 = vmul.f32 %v2426_v43, %v2424_v41 }
 0x131   :  { %v288_v49 = vmul.f32 0.0, %v2428_v45  ;;  %v2430_v55 = vpop.eup %2429 }
 0x133   :  { %v2781_v54 = vadd.f32 %v289_v50, %v288_v49 }
 0x135   :  { %2431 = vtanh.f32 %v2781_v54 }
 0x13f   :  { %v2432_v56 = vpop.eup %2431 }
 0x140   :  { %v292_v59 = vmul.f32 %v2432_v56, %v2430_v55 }
 0x142   :  { %360 = vmatmul.mubr.f32.vlgmr.msra.gmra.mrb[2].mxu0 %v292_v59  ;;  %431 = vmatmul.mubr.f32.vlgmr.msra.gmra.mrb[2].mxu1 %v292_v59 }
 0x143   :  { %2004 = vmatpush1.bf16.msra.mxu0 %v2644_v9  ;;  %2036 = vmatpush1.bf16.msra.mxu1 %v2647_v13 }
 0x144   :  { %2006 = vmatprep.subr.bf16.mxu0 %v2651_v17  ;;  %2038 = vmatprep.subr.bf16.mxu1 %v2653_v18 }
 0x145   :  { %557 = vmatprep.mubr.f32.mxu0 %v2596_v0  ;;  %628 = vmatprep.mubr.f32.mxu1 %v2596_v0 }
 0x147   :  { %2008 = vmatpush1.bf16.msra.mxu0 %v2656_v22  ;;  %2040 = vmatpush1.bf16.msra.mxu1 %v2660_v26 }
 0x148   :  { %2010 = vmatprep.subr.bf16.mxu0 %v2662_v27  ;;  %2042 = vmatprep.subr.bf16.mxu1 %v2664_v31 }
 0x14b   :  { %2012 = vmatpush1.bf16.msra.mxu0 %v2667_v35  ;;  %2044 = vmatpush1.bf16.msra.mxu1 %v2671_v39 }
 0x14c   :  { %2014 = vmatprep.subr.bf16.mxu0 %v2673_v40  ;;  %2046 = vmatprep.subr.bf16.mxu1 %v2676_v44 }
 0x14f   :  { %2016 = vmatpush1.bf16.msra.mxu0 %v2679_v51  ;;  %2048 = vmatpush1.bf16.msra.mxu1 %v2683_v52 }
 0x150   :  { %2018 = vmatprep.subr.bf16.mxu0 %v2685_v53  ;;  %2050 = vmatprep.subr.bf16.mxu1 %v2688_v57 }
 0x153   :  { %2020 = vmatpush1.bf16.msra.mxu0 %v2691_v63  ;;  %2052 = vmatpush1.bf16.msra.mxu1 %v2695_v1 }
 0x154   :  { %2022 = vmatprep.subr.bf16.mxu0 %v2697_v2  ;;  %2054 = vmatprep.subr.bf16.mxu1 %v2700_v7 }
 0x157   :  { %2024 = vmatpush1.bf16.msra.mxu0 %v2703_v16  ;;  %2056 = vmatpush1.bf16.msra.mxu1 %v2707_v19 }
 0x158   :  { %2026 = vmatprep.subr.bf16.mxu0 %v2709_v20  ;;  %2058 = vmatprep.subr.bf16.mxu1 %v2712_v25 }
 0x15b   :  { %2028 = vmatpush1.bf16.msra.mxu0 %v2715_v34  ;;  %2060 = vmatpush1.bf16.msra.mxu1 %v2719_v36 }
 0x15c   :  { %2030 = vmatprep.subr.bf16.mxu0 %v2721_v37  ;;  %2062 = vmatprep.subr.bf16.mxu1 %v2724_v42 }
 0x15f   :  { %2032 = vmatpush1.bf16.msra.mxu0 %v2727_v46  ;;  %2064 = vmatpush1.bf16.msra.mxu1 %v2731_v47 }
 0x160   :  { %2066 = vmatprep.subr.bf16.mxu0 %v2640_v4  ;;  %2098 = vmatprep.subr.bf16.mxu1 %v2642_v8 }
 0x215   :  { %v361_v60 = vpop.f32.mrb[2].mxu0  ;;  %v432_v61 = vpop.f32.mrb[2].mxu1 }
 0x216   :  { %v363_v62 = vpop.f32.mrb[3].mxu0  ;;  %v434_v3 = vpop.f32.mrb[3].mxu1 }
 0x217   :  { %v441_v5 = vcombine.low %v361_v60, %v363_v62  ;;  %v442_v6 = vcombine.low %v432_v61, %v434_v3 }
 0x219   :  { %v449_v10 = vrot.slane %v441_v5, %v2774_v58  ;;  %v456_v11 = vrot.slane %v442_v6, %v2774_v58 }
 0x21b   :  { %v457_v14 = vcombine.low %v449_v10, %v456_v11 }
 0x21d   :  { %v459_v15 = vadd.f32 %v1792_v12, %v457_v14 }
 0x21f   :  { %v1793_v21 = vmul.f32 -1.442695, %v459_v15  ;;  %v467_v23 = vrot.slane %v459_v15, 2  ;;  %v478_v28 = vrot.slane %v459_v15, 6  ;;  %v475_v32 = vrot.slane %v459_v15, 4  ;;  %v1796_v15 = vld [vmem:[%s3110_s0 + $0x10] sm:$0xff] }
 0x221   :  { %2433 = vpow2.f32 %v1793_v21  ;;  %v1794_v24 = vmul.f32 -1.442695, %v467_v23  ;;  %v1795_v29 = vmul.f32 -1.442695, %v478_v28 }
 0x223   :  { %2435 = vpow2.f32 %v1794_v24 }
 0x224   :  { %2437 = vpow2.f32 %v1795_v29 }
 0x22b   :  { %v2434_v30 = vpop.eup %2433 }
 0x22c   :  { %v463_v33 = vadd.f32 1.0, %v2434_v30 }
 0x22d   :  { %v2436_v38 = vpop.eup %2435 }
 0x22e   :  { %2439 = vrcp.f32 %v463_v33  ;;  %v472_v41 = vadd.f32 1.0, %v2436_v38  ;;  %v2438_v43 = vpop.eup %2437 }
 0x22f   :  { %2441 = vtanh.f32 %v475_v32  ;;  %v483_v50 = vadd.f32 1.0, %v2438_v43 }
 0x230   :  { %2443 = vrcp.f32 %v472_v41 }
 0x231   :  { %2445 = vrcp.f32 %v483_v50 }
 0x238   :  { %v2440_v45 = vpop.eup %2439 }
 0x239   :  { %v2442_v48 = vpop.eup %2441 }
 0x23a   :  { %v2444_v49 = vpop.eup %2443  ;;  %v487_v56 = vmul.f32 %v2442_v48, %v2440_v45 }
 0x23b   :  { %v486_v55 = vmul.f32 %v2444_v49, %v2781_v54  ;;  %v2446_v60 = vpop.eup %2445 }
 0x23d   :  { %v2824_v59 = vadd.f32 %v487_v56, %v486_v55 }
 0x23f   :  { %2447 = vtanh.f32 %v2824_v59 }
 0x249   :  { %v2448_v61 = vpop.eup %2447 }
 0x24a   :  { %v490_v62 = vmul.f32 %v2448_v61, %v2446_v60 }
 0x24c   :  { %558 = vmatmul.mubr.f32.vlgmr.msra.gmra.mrb[4].mxu0 %v490_v62  ;;  %629 = vmatmul.mubr.f32.vlgmr.msra.gmra.mrb[4].mxu1 %v490_v62 }
 0x24d   :  { %2068 = vmatpush1.bf16.msra.mxu0 %v2644_v9  ;;  %2100 = vmatpush1.bf16.msra.mxu1 %v2647_v13 }
 0x24e   :  { %2070 = vmatprep.subr.bf16.mxu0 %v2651_v17  ;;  %2102 = vmatprep.subr.bf16.mxu1 %v2653_v18 }
 0x24f   :  { %755 = vmatprep.mubr.f32.mxu0 %v2596_v0  ;;  %826 = vmatprep.mubr.f32.mxu1 %v2596_v0 }
 0x251   :  { %2072 = vmatpush1.bf16.msra.mxu0 %v2656_v22  ;;  %2104 = vmatpush1.bf16.msra.mxu1 %v2660_v26 }
 0x252   :  { %2074 = vmatprep.subr.bf16.mxu0 %v2662_v27  ;;  %2106 = vmatprep.subr.bf16.mxu1 %v2664_v31 }
 0x255   :  { %2076 = vmatpush1.bf16.msra.mxu0 %v2667_v35  ;;  %2108 = vmatpush1.bf16.msra.mxu1 %v2671_v39 }
 0x256   :  { %2078 = vmatprep.subr.bf16.mxu0 %v2673_v40  ;;  %2110 = vmatprep.subr.bf16.mxu1 %v2676_v44 }
 0x259   :  { %2080 = vmatpush1.bf16.msra.mxu0 %v2679_v51  ;;  %2112 = vmatpush1.bf16.msra.mxu1 %v2683_v52 }
 0x25a   :  { %2082 = vmatprep.subr.bf16.mxu0 %v2685_v53  ;;  %2114 = vmatprep.subr.bf16.mxu1 %v2688_v57 }
 0x25d   :  { %2084 = vmatpush1.bf16.msra.mxu0 %v2691_v63  ;;  %2116 = vmatpush1.bf16.msra.mxu1 %v2695_v1 }
 0x25e   :  { %2086 = vmatprep.subr.bf16.mxu0 %v2697_v2  ;;  %2118 = vmatprep.subr.bf16.mxu1 %v2700_v7 }
 0x261   :  { %2088 = vmatpush1.bf16.msra.mxu0 %v2703_v16  ;;  %2120 = vmatpush1.bf16.msra.mxu1 %v2707_v19 }
 0x262   :  { %2090 = vmatprep.subr.bf16.mxu0 %v2709_v20  ;;  %2122 = vmatprep.subr.bf16.mxu1 %v2712_v25 }
 0x265   :  { %2092 = vmatpush1.bf16.msra.mxu0 %v2715_v34  ;;  %2124 = vmatpush1.bf16.msra.mxu1 %v2719_v36 }
 0x266   :  { %2094 = vmatprep.subr.bf16.mxu0 %v2721_v37  ;;  %2126 = vmatprep.subr.bf16.mxu1 %v2724_v42 }
 0x269   :  { %2096 = vmatpush1.bf16.msra.mxu0 %v2727_v46  ;;  %2128 = vmatpush1.bf16.msra.mxu1 %v2731_v47 }
 0x26a   :  { %2130 = vmatprep.subr.bf16.mxu0 %v2640_v4  ;;  %2162 = vmatprep.subr.bf16.mxu1 %v2642_v8 }
 0x31f   :  { %v559_v54 = vpop.f32.mrb[4].mxu0  ;;  %v630_v3 = vpop.f32.mrb[4].mxu1 }
 0x320   :  { %v561_v5 = vpop.f32.mrb[5].mxu0  ;;  %v632_v6 = vpop.f32.mrb[5].mxu1 }
 0x321   :  { %v639_v10 = vcombine.low %v559_v54, %v561_v5  ;;  %v640_v11 = vcombine.low %v630_v3, %v632_v6 }
 0x323   :  { %v647_v12 = vrot.slane %v639_v10, %v2774_v58  ;;  %v654_v14 = vrot.slane %v640_v11, %v2774_v58 }
 0x325   :  { %v655_v21 = vcombine.low %v647_v12, %v654_v14 }
 0x327   :  { %v657_v23 = vadd.f32 %v1796_v15, %v655_v21 }
 0x329   :  { %v1797_v24 = vmul.f32 -1.442695, %v657_v23  ;;  %v665_v28 = vrot.slane %v657_v23, 2  ;;  %v676_v30 = vrot.slane %v657_v23, 6  ;;  %v673_v38 = vrot.slane %v657_v23, 4  ;;  %v1800_v23 = vld [vmem:[%s3110_s0 + $0x18] sm:$0xff] }
 0x32b   :  { %2449 = vpow2.f32 %v1797_v24  ;;  %v1798_v29 = vmul.f32 -1.442695, %v665_v28  ;;  %v1799_v32 = vmul.f32 -1.442695, %v676_v30 }
 0x32d   :  { %2451 = vpow2.f32 %v1798_v29 }
 0x32e   :  { %2453 = vpow2.f32 %v1799_v32 }
 0x335   :  { %v2450_v33 = vpop.eup %2449 }
 0x336   :  { %v661_v41 = vadd.f32 1.0, %v2450_v33 }
 0x337   :  { %v2452_v43 = vpop.eup %2451 }
 0x338   :  { %2455 = vrcp.f32 %v661_v41  ;;  %v670_v45 = vadd.f32 1.0, %v2452_v43  ;;  %v2454_v48 = vpop.eup %2453 }
 0x339   :  { %2457 = vtanh.f32 %v673_v38  ;;  %v681_v56 = vadd.f32 1.0, %v2454_v48 }
 0x33a   :  { %2459 = vrcp.f32 %v670_v45 }
 0x33b   :  { %2461 = vrcp.f32 %v681_v56 }
 0x342   :  { %v2456_v49 = vpop.eup %2455 }
 0x343   :  { %v2458_v50 = vpop.eup %2457 }
 0x344   :  { %v2460_v55 = vpop.eup %2459  ;;  %v685_v61 = vmul.f32 %v2458_v50, %v2456_v49 }
 0x345   :  { %v684_v60 = vmul.f32 %v2460_v55, %v2824_v59  ;;  %v2462_v54 = vpop.eup %2461 }
 0x347   :  { %v2867_v62 = vadd.f32 %v685_v61, %v684_v60 }
 0x349   :  { %2463 = vtanh.f32 %v2867_v62 }
 0x353   :  { %v2464_v3 = vpop.eup %2463 }
 0x354   :  { %v688_v5 = vmul.f32 %v2464_v3, %v2462_v54 }
 0x356   :  { %756 = vmatmul.mubr.f32.vlgmr.msra.gmra.mrb[6].mxu0 %v688_v5  ;;  %827 = vmatmul.mubr.f32.vlgmr.msra.gmra.mrb[6].mxu1 %v688_v5 }
 0x357   :  { %2132 = vmatpush1.bf16.msra.mxu0 %v2644_v9  ;;  %2164 = vmatpush1.bf16.msra.mxu1 %v2647_v13 }
 0x358   :  { %2134 = vmatprep.subr.bf16.mxu0 %v2651_v17  ;;  %2166 = vmatprep.subr.bf16.mxu1 %v2653_v18 }
 0x359   :  { %953 = vmatprep.mubr.f32.mxu0 %v2596_v0  ;;  %1024 = vmatprep.mubr.f32.mxu1 %v2596_v0 }
 0x35b   :  { %2136 = vmatpush1.bf16.msra.mxu0 %v2656_v22  ;;  %2168 = vmatpush1.bf16.msra.mxu1 %v2660_v26 }
 0x35c   :  { %2138 = vmatprep.subr.bf16.mxu0 %v2662_v27  ;;  %2170 = vmatprep.subr.bf16.mxu1 %v2664_v31 }
 0x35f   :  { %2140 = vmatpush1.bf16.msra.mxu0 %v2667_v35  ;;  %2172 = vmatpush1.bf16.msra.mxu1 %v2671_v39 }
 0x360   :  { %2142 = vmatprep.subr.bf16.mxu0 %v2673_v40  ;;  %2174 = vmatprep.subr.bf16.mxu1 %v2676_v44 }
 0x363   :  { %2144 = vmatpush1.bf16.msra.mxu0 %v2679_v51  ;;  %2176 = vmatpush1.bf16.msra.mxu1 %v2683_v52 }
 0x364   :  { %2146 = vmatprep.subr.bf16.mxu0 %v2685_v53  ;;  %2178 = vmatprep.subr.bf16.mxu1 %v2688_v57 }
 0x367   :  { %2148 = vmatpush1.bf16.msra.mxu0 %v2691_v63  ;;  %2180 = vmatpush1.bf16.msra.mxu1 %v2695_v1 }
 0x368   :  { %2150 = vmatprep.subr.bf16.mxu0 %v2697_v2  ;;  %2182 = vmatprep.subr.bf16.mxu1 %v2700_v7 }
 0x36b   :  { %2152 = vmatpush1.bf16.msra.mxu0 %v2703_v16  ;;  %2184 = vmatpush1.bf16.msra.mxu1 %v2707_v19 }
 0x36c   :  { %2154 = vmatprep.subr.bf16.mxu0 %v2709_v20  ;;  %2186 = vmatprep.subr.bf16.mxu1 %v2712_v25 }
 0x36f   :  { %2156 = vmatpush1.bf16.msra.mxu0 %v2715_v34  ;;  %2188 = vmatpush1.bf16.msra.mxu1 %v2719_v36 }
 0x370   :  { %2158 = vmatprep.subr.bf16.mxu0 %v2721_v37  ;;  %2190 = vmatprep.subr.bf16.mxu1 %v2724_v42 }
 0x373   :  { %2160 = vmatpush1.bf16.msra.mxu0 %v2727_v46  ;;  %2192 = vmatpush1.bf16.msra.mxu1 %v2731_v47 }
 0x374   :  { %2194 = vmatprep.subr.bf16.mxu0 %v2640_v4  ;;  %2226 = vmatprep.subr.bf16.mxu1 %v2642_v8 }
 0x429   :  { %v757_v59 = vpop.f32.mrb[6].mxu0  ;;  %v828_v6 = vpop.f32.mrb[6].mxu1 }
 0x42a   :  { %v759_v10 = vpop.f32.mrb[7].mxu0  ;;  %v830_v11 = vpop.f32.mrb[7].mxu1 }
 0x42b   :  { %v837_v12 = vcombine.low %v757_v59, %v759_v10  ;;  %v838_v14 = vcombine.low %v828_v6, %v830_v11 }
 0x42d   :  { %v845_v15 = vrot.slane %v837_v12, %v2774_v58  ;;  %v852_v21 = vrot.slane %v838_v14, %v2774_v58 }
 0x42f   :  { %v853_v24 = vcombine.low %v845_v15, %v852_v21 }
 0x431   :  { %v855_v28 = vadd.f32 %v1800_v23, %v853_v24 }
 0x433   :  { %v1801_v29 = vmul.f32 -1.442695, %v855_v28  ;;  %v863_v30 = vrot.slane %v855_v28, 2  ;;  %v874_v33 = vrot.slane %v855_v28, 6  ;;  %v871_v43 = vrot.slane %v855_v28, 4  ;;  %v1804_v28 = vld [vmem:[%s3110_s0 + $0x20] sm:$0xff] }
 0x435   :  { %2465 = vpow2.f32 %v1801_v29  ;;  %v1802_v32 = vmul.f32 -1.442695, %v863_v30  ;;  %v1803_v38 = vmul.f32 -1.442695, %v874_v33 }
 0x437   :  { %2467 = vpow2.f32 %v1802_v32 }
 0x438   :  { %2469 = vpow2.f32 %v1803_v38 }
 0x43f   :  { %v2466_v41 = vpop.eup %2465 }
 0x440   :  { %v859_v45 = vadd.f32 1.0, %v2466_v41 }
 0x441   :  { %v2468_v48 = vpop.eup %2467 }
 0x442   :  { %2471 = vrcp.f32 %v859_v45  ;;  %v868_v49 = vadd.f32 1.0, %v2468_v48  ;;  %v2470_v50 = vpop.eup %2469 }
 0x443   :  { %2473 = vtanh.f32 %v871_v43  ;;  %v879_v61 = vadd.f32 1.0, %v2470_v50 }
 0x444   :  { %2475 = vrcp.f32 %v868_v49 }
 0x445   :  { %2477 = vrcp.f32 %v879_v61 }
 0x44c   :  { %v2472_v55 = vpop.eup %2471 }
 0x44d   :  { %v2474_v56 = vpop.eup %2473 }
 0x44e   :  { %v2476_v60 = vpop.eup %2475  ;;  %v883_v3 = vmul.f32 %v2474_v56, %v2472_v55 }
 0x44f   :  { %v882_v54 = vmul.f32 %v2476_v60, %v2867_v62  ;;  %v2478_v59 = vpop.eup %2477 }
 0x451   :  { %v2910_v5 = vadd.f32 %v883_v3, %v882_v54 }
 0x453   :  { %2479 = vtanh.f32 %v2910_v5 }
 0x45d   :  { %v2480_v6 = vpop.eup %2479 }
 0x45e   :  { %v886_v10 = vmul.f32 %v2480_v6, %v2478_v59 }
 0x460   :  { %954 = vmatmul.mubr.f32.vlgmr.msra.gmra.mrb[8].mxu0 %v886_v10  ;;  %1025 = vmatmul.mubr.f32.vlgmr.msra.gmra.mrb[8].mxu1 %v886_v10 }
 0x461   :  { %2196 = vmatpush1.bf16.msra.mxu0 %v2644_v9  ;;  %2228 = vmatpush1.bf16.msra.mxu1 %v2647_v13 }
 0x462   :  { %2198 = vmatprep.subr.bf16.mxu0 %v2651_v17  ;;  %2230 = vmatprep.subr.bf16.mxu1 %v2653_v18 }
 0x463   :  { %1151 = vmatprep.mubr.f32.mxu0 %v2596_v0  ;;  %1222 = vmatprep.mubr.f32.mxu1 %v2596_v0 }
 0x465   :  { %2200 = vmatpush1.bf16.msra.mxu0 %v2656_v22  ;;  %2232 = vmatpush1.bf16.msra.mxu1 %v2660_v26 }
 0x466   :  { %2202 = vmatprep.subr.bf16.mxu0 %v2662_v27  ;;  %2234 = vmatprep.subr.bf16.mxu1 %v2664_v31 }
 0x469   :  { %2204 = vmatpush1.bf16.msra.mxu0 %v2667_v35  ;;  %2236 = vmatpush1.bf16.msra.mxu1 %v2671_v39 }
 0x46a   :  { %2206 = vmatprep.subr.bf16.mxu0 %v2673_v40  ;;  %2238 = vmatprep.subr.bf16.mxu1 %v2676_v44 }
 0x46d   :  { %2208 = vmatpush1.bf16.msra.mxu0 %v2679_v51  ;;  %2240 = vmatpush1.bf16.msra.mxu1 %v2683_v52 }
 0x46e   :  { %2210 = vmatprep.subr.bf16.mxu0 %v2685_v53  ;;  %2242 = vmatprep.subr.bf16.mxu1 %v2688_v57 }
 0x471   :  { %2212 = vmatpush1.bf16.msra.mxu0 %v2691_v63  ;;  %2244 = vmatpush1.bf16.msra.mxu1 %v2695_v1 }
 0x472   :  { %2214 = vmatprep.subr.bf16.mxu0 %v2697_v2  ;;  %2246 = vmatprep.subr.bf16.mxu1 %v2700_v7 }
 0x475   :  { %2216 = vmatpush1.bf16.msra.mxu0 %v2703_v16  ;;  %2248 = vmatpush1.bf16.msra.mxu1 %v2707_v19 }
 0x476   :  { %2218 = vmatprep.subr.bf16.mxu0 %v2709_v20  ;;  %2250 = vmatprep.subr.bf16.mxu1 %v2712_v25 }
 0x479   :  { %2220 = vmatpush1.bf16.msra.mxu0 %v2715_v34  ;;  %2252 = vmatpush1.bf16.msra.mxu1 %v2719_v36 }
 0x47a   :  { %2222 = vmatprep.subr.bf16.mxu0 %v2721_v37  ;;  %2254 = vmatprep.subr.bf16.mxu1 %v2724_v42 }
 0x47d   :  { %2224 = vmatpush1.bf16.msra.mxu0 %v2727_v46  ;;  %2256 = vmatpush1.bf16.msra.mxu1 %v2731_v47 }
 0x47e   :  { %2258 = vmatprep.subr.bf16.mxu0 %v2640_v4  ;;  %2290 = vmatprep.subr.bf16.mxu1 %v2642_v8 }
 0x533   :  { %v955_v62 = vpop.f32.mrb[8].mxu0  ;;  %v1026_v11 = vpop.f32.mrb[8].mxu1 }
 0x534   :  { %v957_v12 = vpop.f32.mrb[9].mxu0  ;;  %v1028_v14 = vpop.f32.mrb[9].mxu1 }
 0x535   :  { %v1035_v15 = vcombine.low %v955_v62, %v957_v12  ;;  %v1036_v21 = vcombine.low %v1026_v11, %v1028_v14 }
 0x537   :  { %v1043_v23 = vrot.slane %v1035_v15, %v2774_v58  ;;  %v1050_v24 = vrot.slane %v1036_v21, %v2774_v58 }
 0x539   :  { %v1051_v29 = vcombine.low %v1043_v23, %v1050_v24 }
 0x53b   :  { %v1053_v30 = vadd.f32 %v1804_v28, %v1051_v29 }
 0x53d   :  { %v1805_v32 = vmul.f32 -1.442695, %v1053_v30  ;;  %v1061_v33 = vrot.slane %v1053_v30, 2  ;;  %v1072_v41 = vrot.slane %v1053_v30, 6  ;;  %v1069_v48 = vrot.slane %v1053_v30, 4  ;;  %v1808_v30 = vld [vmem:[%s3110_s0 + $0x28] sm:$0xff] }
 0x53f   :  { %2481 = vpow2.f32 %v1805_v32  ;;  %v1806_v38 = vmul.f32 -1.442695, %v1061_v33  ;;  %v1807_v43 = vmul.f32 -1.442695, %v1072_v41 }
 0x541   :  { %2483 = vpow2.f32 %v1806_v38 }
 0x542   :  { %2485 = vpow2.f32 %v1807_v43 }
 0x549   :  { %v2482_v45 = vpop.eup %2481 }
 0x54a   :  { %v1057_v49 = vadd.f32 1.0, %v2482_v45 }
 0x54b   :  { %v2484_v50 = vpop.eup %2483 }
 0x54c   :  { %2487 = vrcp.f32 %v1057_v49  ;;  %v1066_v55 = vadd.f32 1.0, %v2484_v50  ;;  %v2486_v56 = vpop.eup %2485 }
 0x54d   :  { %2489 = vtanh.f32 %v1069_v48  ;;  %v1077_v3 = vadd.f32 1.0, %v2486_v56 }
 0x54e   :  { %2491 = vrcp.f32 %v1066_v55 }
 0x54f   :  { %2493 = vrcp.f32 %v1077_v3 }
 0x556   :  { %v2488_v60 = vpop.eup %2487 }
 0x557   :  { %v2490_v61 = vpop.eup %2489 }
 0x558   :  { %v2492_v54 = vpop.eup %2491  ;;  %v1081_v6 = vmul.f32 %v2490_v61, %v2488_v60 }
 0x559   :  { %v1080_v59 = vmul.f32 %v2492_v54, %v2910_v5  ;;  %v2494_v62 = vpop.eup %2493 }
 0x55b   :  { %v2953_v10 = vadd.f32 %v1081_v6, %v1080_v59 }
 0x55d   :  { %2495 = vtanh.f32 %v2953_v10 }
 0x567   :  { %v2496_v11 = vpop.eup %2495 }
 0x568   :  { %v1084_v12 = vmul.f32 %v2496_v11, %v2494_v62 }
 0x56a   :  { %1152 = vmatmul.mubr.f32.vlgmr.msra.gmra.mrb[10].mxu0 %v1084_v12  ;;  %1223 = vmatmul.mubr.f32.vlgmr.msra.gmra.mrb[10].mxu1 %v1084_v12 }
 0x56b   :  { %2260 = vmatpush1.bf16.msra.mxu0 %v2644_v9  ;;  %2292 = vmatpush1.bf16.msra.mxu1 %v2647_v13 }
 0x56c   :  { %2262 = vmatprep.subr.bf16.mxu0 %v2651_v17  ;;  %2294 = vmatprep.subr.bf16.mxu1 %v2653_v18 }
 0x56d   :  { %1349 = vmatprep.mubr.f32.mxu0 %v2596_v0  ;;  %1420 = vmatprep.mubr.f32.mxu1 %v2596_v0 }
 0x56f   :  { %2264 = vmatpush1.bf16.msra.mxu0 %v2656_v22  ;;  %2296 = vmatpush1.bf16.msra.mxu1 %v2660_v26 }
 0x570   :  { %2266 = vmatprep.subr.bf16.mxu0 %v2662_v27  ;;  %2298 = vmatprep.subr.bf16.mxu1 %v2664_v31 }
 0x573   :  { %2268 = vmatpush1.bf16.msra.mxu0 %v2667_v35  ;;  %2300 = vmatpush1.bf16.msra.mxu1 %v2671_v39 }
 0x574   :  { %2270 = vmatprep.subr.bf16.mxu0 %v2673_v40  ;;  %2302 = vmatprep.subr.bf16.mxu1 %v2676_v44 }
 0x577   :  { %2272 = vmatpush1.bf16.msra.mxu0 %v2679_v51  ;;  %2304 = vmatpush1.bf16.msra.mxu1 %v2683_v52 }
 0x578   :  { %2274 = vmatprep.subr.bf16.mxu0 %v2685_v53  ;;  %2306 = vmatprep.subr.bf16.mxu1 %v2688_v57 }
 0x57b   :  { %2276 = vmatpush1.bf16.msra.mxu0 %v2691_v63  ;;  %2308 = vmatpush1.bf16.msra.mxu1 %v2695_v1 }
 0x57c   :  { %2278 = vmatprep.subr.bf16.mxu0 %v2697_v2  ;;  %2310 = vmatprep.subr.bf16.mxu1 %v2700_v7 }
 0x57f   :  { %2280 = vmatpush1.bf16.msra.mxu0 %v2703_v16  ;;  %2312 = vmatpush1.bf16.msra.mxu1 %v2707_v19 }
 0x580   :  { %2282 = vmatprep.subr.bf16.mxu0 %v2709_v20  ;;  %2314 = vmatprep.subr.bf16.mxu1 %v2712_v25 }
 0x583   :  { %2284 = vmatpush1.bf16.msra.mxu0 %v2715_v34  ;;  %2316 = vmatpush1.bf16.msra.mxu1 %v2719_v36 }
 0x584   :  { %2286 = vmatprep.subr.bf16.mxu0 %v2721_v37  ;;  %2318 = vmatprep.subr.bf16.mxu1 %v2724_v42 }
 0x587   :  { %2288 = vmatpush1.bf16.msra.mxu0 %v2727_v46  ;;  %2320 = vmatpush1.bf16.msra.mxu1 %v2731_v47 }
 0x588   :  { %2322 = vmatprep.subr.bf16.mxu0 %v2640_v4  ;;  %2354 = vmatprep.subr.bf16.mxu1 %v2642_v8 }
 0x63d   :  { %v1153_v5 = vpop.f32.mrb[10].mxu0  ;;  %v1224_v14 = vpop.f32.mrb[10].mxu1 }
 0x63e   :  { %v1155_v15 = vpop.f32.mrb[11].mxu0  ;;  %v1226_v21 = vpop.f32.mrb[11].mxu1 }
 0x63f   :  { %v1233_v23 = vcombine.low %v1153_v5, %v1155_v15  ;;  %v1234_v24 = vcombine.low %v1224_v14, %v1226_v21  ;;  %v1679_v15 = vld [vmem:[%s3112_s2] sm:$0xff]  ;;  %v1680_v21 = vld [vmem:[%s3112_s2 + $0x8] sm:$0xff] }
 0x641   :  { %v1241_v28 = vrot.slane %v1233_v23, %v2774_v58  ;;  %v1248_v29 = vrot.slane %v1234_v24, %v2774_v58  ;;  %v2386_v23 = vpack.c.bf16 %v1680_v21, %v1679_v15  ;;  %v2598_v24 = vmov 0.0|0.0  }
 0x643   :  { %v1249_v32 = vcombine.low %v1241_v28, %v1248_v29  ;;  %v1681_v28 = vld [vmem:[%s3112_s2 + $0x10] sm:$0xff]  ;;  %v1682_v29 = vld [vmem:[%s3112_s2 + $0x18] sm:$0xff] }
 0x645   :  { %v1251_v33 = vadd.f32 %v1808_v30, %v1249_v32  ;;  %v2389_v30 = vpack.c.bf16 %v1682_v29, %v1681_v28  ;;  %v1683_v32 = vld [vmem:[%s3112_s2 + $0x20] sm:$0xff] }
 0x647   :  { %v1809_v38 = vmul.f32 -1.442695, %v1251_v33  ;;  %v1259_v4 = vrot.slane %v1251_v33, 2  ;;  %v1270_v41 = vrot.slane %v1251_v33, 6  ;;  %v1267_v48 = vrot.slane %v1251_v33, 4  ;;  %v1684_v33 = vld [vmem:[%s3112_s2 + $0x28] sm:$0xff] }
 0x649   :  { %2497 = vpow2.f32 %v1809_v38  ;;  %v1810_v8 = vmul.f32 -1.442695, %v1259_v4  ;;  %v1811_v43 = vmul.f32 -1.442695, %v1270_v41  ;;  %v2392_v38 = vpack.c.bf16 %v1684_v33, %v1683_v32  ;;  %v1685_v4 = vld [vmem:[%s3112_s2 + $0x30] sm:$0xff] }
 0x64b   :  { %2499 = vpow2.f32 %v1810_v8  ;;  %v1686_v8 = vld [vmem:[%s3112_s2 + $0x38] sm:$0xff] }
 0x64c   :  { %2501 = vpow2.f32 %v1811_v43  ;;  %v2395_v41 = vpack.c.bf16 %v1686_v8, %v1685_v4  ;;  %v1687_v43 = vld [vmem:[%s3112_s2 + $0x40] sm:$0xff] }
 0x653   :  { %v2498_v45 = vpop.eup %2497 }
 0x654   :  { %v1255_v49 = vadd.f32 1.0, %v2498_v45 }
 0x655   :  { %v2500_v50 = vpop.eup %2499 }
 0x656   :  { %2503 = vrcp.f32 %v1255_v49  ;;  %v1264_v55 = vadd.f32 1.0, %v2500_v50  ;;  %v2502_v56 = vpop.eup %2501  ;;  %v1690_v49 = vld [vmem:[%s3112_s2 + $0x58] sm:$0xff] }
 0x657   :  { %2505 = vtanh.f32 %v1267_v48  ;;  %v1275_v3 = vadd.f32 1.0, %v2502_v56  ;;  %v1689_v48 = vld [vmem:[%s3112_s2 + $0x50] sm:$0xff]  ;;  %v1692_v56 = vld [vmem:[%s3112_s2 + $0x68] sm:$0xff] }
 0x658   :  { %2507 = vrcp.f32 %v1264_v55  ;;  %v2401_v50 = vpack.c.bf16 %v1690_v49, %v1689_v48  ;;  %v1691_v55 = vld [vmem:[%s3112_s2 + $0x60] sm:$0xff] }
 0x659   :  { %2509 = vrcp.f32 %v1275_v3 }
 0x660   :  { %v2504_v60 = vpop.eup %2503 }
 0x661   :  { %v2506_v61 = vpop.eup %2505 }
 0x662   :  { %v2508_v54 = vpop.eup %2507  ;;  %v1279_v6 = vmul.f32 %v2506_v61, %v2504_v60  ;;  %v2404_v60 = vpack.c.bf16 %v1692_v56, %v1691_v55  ;;  %v1693_v61 = vld [vmem:[%s3112_s2 + $0x70] sm:$0xff] }
 0x663   :  { %v1278_v59 = vmul.f32 %v2508_v54, %v2953_v10  ;;  %v2510_v11 = vpop.eup %2509  ;;  %v1694_v54 = vld [vmem:[%s3112_s2 + $0x78] sm:$0xff] }
 0x664   :  { %v2407_v3 = vpack.c.bf16 %v1694_v54, %v1693_v61 }
 0x665   :  { %v2996_v62 = vadd.f32 %v1279_v6, %v1278_v59 }
 0x667   :  { %2511 = vtanh.f32 %v2996_v62 }
 0x671   :  { %v2512_v12 = vpop.eup %2511 }
 0x672   :  { %v1282_v5 = vmul.f32 %v2512_v12, %v2510_v11 }
 0x674   :  { %1350 = vmatmul.mubr.f32.vlgmr.msra.gmra.mrb[12].mxu0 %v1282_v5  ;;  %1421 = vmatmul.mubr.f32.vlgmr.msra.gmra.mrb[12].mxu1 %v1282_v5 }
 0x675   :  { %2324 = vmatpush1.bf16.msra.mxu0 %v2644_v9  ;;  %2356 = vmatpush1.bf16.msra.mxu1 %v2647_v13 }
 0x676   :  { %2326 = vmatprep.subr.bf16.mxu0 %v2651_v17  ;;  %2358 = vmatprep.subr.bf16.mxu1 %v2653_v18 }
 0x677   :  { %1547 = vmatprep.mubr.f32.mxu0 %v2596_v0  ;;  %1618 = vmatprep.mubr.f32.mxu1 %v2596_v0 }
 0x679   :  { %2328 = vmatpush1.bf16.msra.mxu0 %v2656_v22  ;;  %2360 = vmatpush1.bf16.msra.mxu1 %v2660_v26 }
 0x67a   :  { %2330 = vmatprep.subr.bf16.mxu0 %v2662_v27  ;;  %2362 = vmatprep.subr.bf16.mxu1 %v2664_v31 }
 0x67d   :  { %2332 = vmatpush1.bf16.msra.mxu0 %v2667_v35  ;;  %2364 = vmatpush1.bf16.msra.mxu1 %v2671_v39  ;;  %v1812_v35 = vld [vmem:[%s3110_s0 + $0x30] sm:$0xff] }
 0x67e   :  { %2334 = vmatprep.subr.bf16.mxu0 %v2673_v40  ;;  %2366 = vmatprep.subr.bf16.mxu1 %v2676_v44 }
 0x681   :  { %2336 = vmatpush1.bf16.msra.mxu0 %v2679_v51  ;;  %2368 = vmatpush1.bf16.msra.mxu1 %v2683_v52 }
 0x682   :  { %2338 = vmatprep.subr.bf16.mxu0 %v2685_v53  ;;  %2370 = vmatprep.subr.bf16.mxu1 %v2688_v57 }
 0x685   :  { %2340 = vmatpush1.bf16.msra.mxu0 %v2691_v63  ;;  %2372 = vmatpush1.bf16.msra.mxu1 %v2695_v1 }
 0x686   :  { %2342 = vmatprep.subr.bf16.mxu0 %v2697_v2  ;;  %2374 = vmatprep.subr.bf16.mxu1 %v2700_v7 }
 0x689   :  { %2344 = vmatpush1.bf16.msra.mxu0 %v2703_v16  ;;  %2376 = vmatpush1.bf16.msra.mxu1 %v2707_v19 }
 0x68a   :  { %2346 = vmatprep.subr.bf16.mxu0 %v2709_v20  ;;  %2378 = vmatprep.subr.bf16.mxu1 %v2712_v25 }
 0x68d   :  { %2348 = vmatpush1.bf16.msra.mxu0 %v2715_v34  ;;  %2380 = vmatpush1.bf16.msra.mxu1 %v2719_v36 }
 0x68e   :  { %2350 = vmatprep.subr.bf16.mxu0 %v2721_v37  ;;  %2382 = vmatprep.subr.bf16.mxu1 %v2724_v42 }
 0x691   :  { %2352 = vmatpush1.bf16.msra.mxu0 %v2727_v46  ;;  %2384 = vmatpush1.bf16.msra.mxu1 %v2731_v47 }
 0x692   :  { %2385 = vmatprep.subr.bf16.mxu0 %v2598_v24 }
 0x747   :  { %v1351_v9 = vpop.f32.mrb[12].mxu0  ;;  %v1422_v13 = vpop.f32.mrb[12].mxu1 }
 0x748   :  { %v1353_v17 = vpop.f32.mrb[13].mxu0  ;;  %v1424_v18 = vpop.f32.mrb[13].mxu1 }
 0x749   :  { %v1431_v22 = vcombine.low %v1351_v9, %v1353_v17  ;;  %v1432_v26 = vcombine.low %v1422_v13, %v1424_v18  ;;  %v1816_v17 = vld [vmem:[%s3110_s0 + $0x38] sm:$0xff] }
 0x74b   :  { %v1439_v27 = vrot.slane %v1431_v22, %v2774_v58  ;;  %v1446_v31 = vrot.slane %v1432_v26, %v2774_v58 }
 0x74d   :  { %v1447_v39 = vcombine.low %v1439_v27, %v1446_v31 }
 0x74f   :  { %v1449_v40 = vadd.f32 %v1812_v35, %v1447_v39 }
 0x751   :  { %v1813_v44 = vmul.f32 -1.442695, %v1449_v40  ;;  %v1457_v51 = vrot.slane %v1449_v40, 2  ;;  %v1468_v53 = vrot.slane %v1449_v40, 6  ;;  %v1465_v1 = vrot.slane %v1449_v40, 4 }
 0x753   :  { %2513 = vpow2.f32 %v1813_v44  ;;  %v1814_v52 = vmul.f32 -1.442695, %v1457_v51  ;;  %v1815_v57 = vmul.f32 -1.442695, %v1468_v53 }
 0x755   :  { %2515 = vpow2.f32 %v1814_v52 }
 0x756   :  { %2517 = vpow2.f32 %v1815_v57 }
 0x75d   :  { %v2514_v63 = vpop.eup %2513 }
 0x75e   :  { %v1453_v2 = vadd.f32 1.0, %v2514_v63 }
 0x75f   :  { %v2516_v7 = vpop.eup %2515 }
 0x760   :  { %2519 = vrcp.f32 %v1453_v2  ;;  %v1462_v16 = vadd.f32 1.0, %v2516_v7  ;;  %v2518_v19 = vpop.eup %2517 }
 0x761   :  { %2521 = vtanh.f32 %v1465_v1  ;;  %v1473_v36 = vadd.f32 1.0, %v2518_v19 }
 0x762   :  { %2523 = vrcp.f32 %v1462_v16 }
 0x763   :  { %2525 = vrcp.f32 %v1473_v36  ;;  %v1820_v36 = vld [vmem:[%s3113_s3] ss:$0 sm:$0xff] }
 0x76a   :  { %v2520_v20 = vpop.eup %2519 }
 0x76b   :  { %v2522_v25 = vpop.eup %2521 }
 0x76c   :  { %v2524_v34 = vpop.eup %2523  ;;  %v1477_v42 = vmul.f32 %v2522_v25, %v2520_v20 }
 0x76d   :  { %v1476_v37 = vmul.f32 %v2524_v34, %v2996_v62  ;;  %v2526_v47 = vpop.eup %2525 }
 0x76f   :  { %v3037_v46 = vadd.f32 %v1477_v42, %v1476_v37 }
 0x771   :  { %2527 = vtanh.f32 %v3037_v46 }
 0x77b   :  { %v2528_v10 = vpop.eup %2527 }
 0x77c   :  { %v1480_v14 = vmul.f32 %v2528_v10, %v2526_v47 }
 0x77e   :  { %1548 = vmatmul.mubr.f32.vlgmr.msra.gmra.mrb[14].mxu0 %v1480_v14  ;;  %1619 = vmatmul.mubr.f32.vlgmr.msra.gmra.mrb[14].mxu1 %v1480_v14 }
 0x77f   :  { %2387 = vmatpush3.bf16.msra.mxu0 %v2386_v23  ;;  %1870 = vmatprep.mubr.msk.f32.mxu0 %vm2599_vm0, %v2596_v0  ;;  %v1688_v0 = vld [vmem:[%s3112_s2 + $0x48] sm:$0xff] }
 0x780   :  { %2388 = vmatprep.subr.bf16.mxu0 %v2598_v24  ;;  %v2398_v45 = vpack.c.bf16 %v1688_v0, %v1687_v43 }
 0x783   :  { %2390 = vmatpush3.bf16.msra.mxu0 %v2389_v30 }
 0x784   :  { %2391 = vmatprep.subr.bf16.mxu0 %v2598_v24 }
 0x787   :  { %2393 = vmatpush3.bf16.msra.mxu0 %v2392_v38 }
 0x788   :  { %2394 = vmatprep.subr.bf16.mxu0 %v2598_v24 }
 0x78b   :  { %2396 = vmatpush3.bf16.msra.mxu0 %v2395_v41 }
 0x78c   :  { %2397 = vmatprep.subr.bf16.mxu0 %v2598_v24 }
 0x78f   :  { %2399 = vmatpush3.bf16.msra.mxu0 %v2398_v45 }
 0x790   :  { %2400 = vmatprep.subr.bf16.mxu0 %v2598_v24 }
 0x793   :  { %2402 = vmatpush3.bf16.msra.mxu0 %v2401_v50 }
 0x794   :  { %2403 = vmatprep.subr.bf16.mxu0 %v2598_v24 }
 0x797   :  { %2405 = vmatpush3.bf16.msra.mxu0 %v2404_v60 }
 0x798   :  { %2406 = vmatprep.subr.bf16.mxu0 %v2598_v24 }
 0x79b   :  { %2408 = vmatpush3.bf16.msra.mxu0 %v2407_v3 }
 0x851   :  { %v1549_v59 = vpop.f32.mrb[14].mxu0  ;;  %v1620_v6 = vpop.f32.mrb[14].mxu1 }
 0x852   :  { %v1551_v62 = vpop.f32.mrb[15].mxu0  ;;  %v1622_v11 = vpop.f32.mrb[15].mxu1 }
 0x853   :  { %v1629_v12 = vcombine.low %v1549_v59, %v1551_v62  ;;  %v1630_v5 = vcombine.low %v1620_v6, %v1622_v11 }
 0x855   :  { %v1637_v9 = vrot.slane %v1629_v12, %v2774_v58  ;;  %v1644_v13 = vrot.slane %v1630_v5, %v2774_v58 }
 0x857   :  { %v1645_v18 = vcombine.low %v1637_v9, %v1644_v13 }
 0x859   :  { %v1647_v22 = vadd.f32 %v1816_v17, %v1645_v18 }
 0x85b   :  { %v1817_v26 = vmul.f32 -1.442695, %v1647_v22  ;;  %v1655_v27 = vrot.slane %v1647_v22, 2  ;;  %v1666_v35 = vrot.slane %v1647_v22, 6  ;;  %v1663_v44 = vrot.slane %v1647_v22, 4 }
 0x85d   :  { %2529 = vpow2.f32 %v1817_v26  ;;  %v1818_v31 = vmul.f32 -1.442695, %v1655_v27  ;;  %v1819_v39 = vmul.f32 -1.442695, %v1666_v35 }
 0x85f   :  { %2531 = vpow2.f32 %v1818_v31 }
 0x860   :  { %2533 = vpow2.f32 %v1819_v39 }
 0x867   :  { %v2530_v40 = vpop.eup %2529 }
 0x868   :  { %v1651_v51 = vadd.f32 1.0, %v2530_v40 }
 0x869   :  { %v2532_v52 = vpop.eup %2531 }
 0x86a   :  { %2535 = vrcp.f32 %v1651_v51  ;;  %v1660_v58 = vadd.f32 1.0, %v2532_v52  ;;  %v2534_v53 = vpop.eup %2533 }
 0x86b   :  { %2537 = vtanh.f32 %v1663_v44  ;;  %v1671_v2 = vadd.f32 1.0, %v2534_v53 }
 0x86c   :  { %2539 = vrcp.f32 %v1660_v58 }
 0x86d   :  { %2541 = vrcp.f32 %v1671_v2 }
 0x874   :  { %v2536_v57 = vpop.eup %2535 }
 0x875   :  { %v2538_v63 = vpop.eup %2537 }
 0x876   :  { %v2540_v1 = vpop.eup %2539  ;;  %v1675_v16 = vmul.f32 %v2538_v63, %v2536_v57 }
 0x877   :  { %v1674_v7 = vmul.f32 %v2540_v1, %v3037_v46  ;;  %v2542_v20 = vpop.eup %2541 }
 0x879   :  { %v1676_v19 = vadd.f32 %v1675_v16, %v1674_v7 }
 0x87b   :  { %2543 = vtanh.f32 %v1676_v19 }
 0x885   :  { %v2544_v25 = vpop.eup %2543 }
 0x886   :  { %v1678_v34 = vmul.f32 %v2544_v25, %v2542_v20 }
 0x888   :  { %1871 = vmatmul.mubr.f32.vlgmr.msra.gmra.mrb[16].mxu0 %v1678_v34 }
 0x95b   :  { %v1768_v37 = vpop.f32.mrb[16].mxu0 }
 0x95c   :  { %v1769_v42 = vadd.f32 %v1820_v36, %v1768_v37  ;;  %v1872_v47 = vpop.f32.mrb[17].mxu0 }
 0x95e   :  { %1773 = vst.msk [vmem:[#allocation5] sm:$0x3] %vm1772_vm1, %v1769_v42 }
 0x95f   :  { %2578 = shalt.err (!%p2575_p12)
}
 0x960   :  { %s2579_s28 = scalar_lea.hbm %s3114_s4, 32 }
 0x961   :  { %p2580_p13 = scmp.ne.s32.totalorder %s3114_s4, %s2579_s28  ;;  %p2583_p0 = scmp.lt.u32.totalorder %s2579_s28, %s3114_s4 }
 0x963   :  { %p2585_p1 = pnand %p2583_p0, %p2580_p13 }
 0x965   :  { %2588 = shalt.err (!%p2585_p1)
}
 0x966   :  { %1783 = dma.vmem_to_hbm [thread:$0]  %s1781_s24, 32, %s3114_s4, [#allocation4]  }
 0x967   :  { %2591 = dma.done.wait [#allocation4], 32  }
 0x968   :  { %2592 = vsyncadd [#allocation4], 4294967264 }
 0x969   :  { %1787 = vsyncpa [#allocation3], 1 }
 0x96a   :  { %1788 = vsyncpa [#allocation4], 1 }

</bundles_post_ra>
